<compile_context>
chip_gen: v6e
topology: v6e:2x2x1
jax: 0.10.0
libtpu: 0.0.40
codegen_flags: <defaults>
</compile_context>

<pallas_src>
import functools

import jax
import jax.numpy as jnp
from jax import lax
from jax.experimental import pallas as pl
from jax.experimental.pallas import tpu as pltpu

EPSILON = 1e-6      # module-global EPSILON referenced by the source's _sharpen
COS_EPS = 1e-8      # F.cosine_similarity default eps (per-norm clamp)
BLOCK_B = 8         # sublane-aligned batch tile (batch padded to multiple of 8)


def ntm_head_kernel(h_ref, wt_ref, m_ref, w0_ref, out_ref, *,
                    mem_feat, max_shift, T):
    """Full T-step NTM-Head addressing rollout for one batch block.

    h_ref : (T, Bb, H+1)  controller states, last column == 1.0 (bias fold)
    wt_ref: (H+1, P)      linear weight with bias as the last row
    m_ref : (Bb, N, M)    memory (fixed over the rollout)
    w0_ref: (Bb, N)       initial addressing weights (reset() -> zeros)
    out_ref:(T, Bb, N)    addressing weights per timestep
    """
    Bb, N, M = m_ref.shape
    H1 = h_ref.shape[2]
    shift_width = 2 * max_shift + 1

    # ---------------- Phase 1: non-recurrent precompute (all T at once) ------
    # One GEMM for every timestep; bias folded into the MXU matmul.
    h_all = h_ref[...].reshape(T * Bb, H1)                             # (T*Bb, H+1)
    proj = jnp.dot(h_all, wt_ref[...],
                   preferred_element_type=jnp.float32)                 # (T*Bb, P)

    # split_hidden_state (canonical NTM scheme), batched over T*Bb rows.
    o = 0
    k_all = jnp.tanh(proj[:, o:o + mem_feat]); o += mem_feat           # (T*Bb, M)
    b_all = jax.nn.softplus(proj[:, o:o + 1]); o += 1                  # (T*Bb, 1)
    g_all = jax.nn.sigmoid(proj[:, o:o + 1]); o += 1                   # (T*Bb, 1)
    s_logits = proj[:, o:o + shift_width]; o += shift_width            # (T*Bb, 2S+1)
    r_all = 1.0 + jax.nn.softplus(proj[:, o:o + 1])                    # (T*Bb, 1)

    # Shift-tap softmax; off the serial chain, so the approx EUP reciprocal
    # is harmless (it does not compound across steps).
    s_e = jnp.exp(s_logits - jnp.max(s_logits, axis=-1, keepdims=True))
    s_all = s_e * pl.reciprocal(jnp.sum(s_e, axis=-1, keepdims=True),
                                approx=True)                           # (T*Bb, 2S+1)

    m = m_ref[...]                                                     # (Bb, N, M)
    inv_m_norm = lax.rsqrt(jnp.maximum(jnp.sum(m * m, axis=2),
                                       COS_EPS * COS_EPS))             # (Bb, N)

    # _find_by_content_addressing for every timestep (independent of w_prev).
    # TODO(synk): at production NTM sizes (N >= 128, M >= 64) route this
    # contraction through the MXU via jnp.einsum('bnm,bm->bn', ...).
    w_c_steps = []
    for t in range(T):                                                 # static, T small
        kt = k_all[t * Bb:(t + 1) * Bb, :]                             # (Bb, M)
        bt = b_all[t * Bb:(t + 1) * Bb, :]                             # (Bb, 1)
        dot = jnp.sum(m * kt[:, None, :], axis=2)                      # (Bb, N)
        inv_k_norm = lax.rsqrt(jnp.maximum(
            jnp.sum(kt * kt, axis=1, keepdims=True),
            COS_EPS * COS_EPS))                                        # (Bb, 1)
        logits = bt * (dot * inv_m_norm * inv_k_norm)
        # softmax over the memory axis (PyTorch F.softmax default dim=1, 2D)
        e = jnp.exp(logits - jnp.max(logits, axis=1, keepdims=True))
        w_c_steps.append(
            e * pl.reciprocal(jnp.sum(e, axis=1, keepdims=True), approx=True))

    # ---------------- Phase 2: the true recurrence ----------------------------
    # Only interpolate -> shift -> sharpen depend on w_prev.  Fully unrolled
    # (equivalent to lax.fori_loop(..., unroll=True) for this static T); the
    # carried weight never leaves vregs.
    # TODO(synk): for large T, switch to pl.loop with the per-step params
    # staged in a VMEM scratch instead of full unrolling.
    w = w0_ref[...]                                                    # (Bb, N)
    for t in range(T):
        g = g_all[t * Bb:(t + 1) * Bb, :]                              # (Bb, 1)
        s = s_all[t * Bb:(t + 1) * Bb, :]                              # (Bb, 2S+1)
        r = r_all[t * Bb:(t + 1) * Bb, :]                              # (Bb, 1)

        # _interpolate_with_current_position (verbatim: w_c + (1-g)*w_prev)
        w_g = w_c_steps[t] + (1.0 - g) * w                             # (Bb, N)

        # _shift_by_location_addressing (circular cross-correlation).
        # NOTE: pltpu.roll wants 128-multiple lane dims; with N = 8 the
        # concat/slice form is safe and its cost is negligible at this size.
        w_unrolled = jnp.concatenate(
            [w_g[:, N - max_shift:], w_g, w_g[:, :max_shift]], axis=1)  # (Bb, N+2S)
        w_s = jnp.zeros_like(w_g)
        for j in range(shift_width):                                   # static unroll
            w_s = w_s + w_unrolled[:, j:j + N] * s[:, j:j + 1]

        # _sharpen.  Clamp guards pow's exp(r*log(.)) path; never binds for
        # these softmax-derived weights.  EXACT divide here: this normalizer
        # feeds the carried weight, so approx error would compound over T.
        w_s = jnp.maximum(w_s, EPSILON)
        w_pow = w_s ** r
        w = w_pow / (jnp.sum(w_pow, axis=1, keepdims=True) + EPSILON)

        out_ref[t] = w.astype(out_ref.dtype)


def head_forward_rollout(h_seq, W, bias, m, w0, *, mem_feat, max_shift):
    """Runs the Head addressing recurrence for all T steps in ONE pallas_call
    with a single grid axis over batch blocks (timesteps handled in-kernel).

    h_seq: (T, B, H) controller hidden states; W: (H, P) weight (h @ W);
    bias: (1, P); m: (B, N, M) memory (fixed over the rollout);
    w0: (B, N) initial weights (reset() -> zeros).  Returns (T, B, N).
    """
    T, B, H = h_seq.shape
    _, N, M = m.shape
    P = W.shape[1]

    # Fold bias into the matmul and pad batch to the 8-sublane granularity so
    # every vreg op is full-width (padded rows are discarded at the end).
    Bp = ((B + BLOCK_B - 1) // BLOCK_B) * BLOCK_B
    pad = Bp - B
    h_aug = jnp.concatenate([h_seq, jnp.ones((T, B, 1), h_seq.dtype)], axis=-1)
    if pad:
        h_aug = jnp.pad(h_aug, ((0, 0), (0, pad), (0, 0)))
        m_p = jnp.pad(m, ((0, pad), (0, 0), (0, 0)))
        w0_p = jnp.pad(w0, ((0, pad), (0, 0)))
    else:
        m_p, w0_p = m, w0
    W_aug = jnp.concatenate([W, bias.reshape(1, P)], axis=0)           # (H+1, P)

    kernel = functools.partial(ntm_head_kernel, mem_feat=mem_feat,
                               max_shift=max_shift, T=T)
    grid = (Bp // BLOCK_B,)   # batch blocks only; T is an in-kernel loop

    # TODO(synk): with batch=2 there is a single batch block, so the
    # "parallel" axis gives v7x's second TensorCore nothing to do; fuse more
    # heads / larger batch onto this axis to use both cores.
    out = pl.pallas_call(
        kernel,
        out_shape=jax.ShapeDtypeStruct((T, Bp, N), jnp.float32),
        grid_spec=pltpu.PrefetchScalarGridSpec(
            num_scalar_prefetch=0,
            grid=grid,
            in_specs=[
                # whole h_seq chunk for this batch block, resident (one DMA)
                pl.BlockSpec((T, BLOCK_B, H + 1), lambda bb: (0, bb, 0)),
                pl.BlockSpec((H + 1, P), lambda bb: (0, 0)),
                pl.BlockSpec((BLOCK_B, N, M), lambda bb: (bb, 0, 0)),
                pl.BlockSpec((BLOCK_B, N), lambda bb: (bb, 0)),
            ],
            # resident output slab: one writeback per batch block
            out_specs=pl.BlockSpec((T, BLOCK_B, N), lambda bb: (0, bb, 0)),
        ),
        compiler_params=pltpu.CompilerParams(
            dimension_semantics=("parallel",)),
    )(h_aug, W_aug, m_p, w0_p)
    return out[:, :B, :]


def head_reference_rollout(h_seq, W, bias, m, w0, *, mem_feat, max_shift):
    """Pure-JAX reference of the same T-step rollout (PyTorch-faithful math,
    per-norm cosine-eps clamp to match both the kernel and F.cosine_similarity)."""
    shift_width = 2 * max_shift + 1
    w = w0
    outs = []
    for t in range(h_seq.shape[0]):
        proj = h_seq[t] @ W + bias
        o = 0
        k = jnp.tanh(proj[:, o:o + mem_feat]); o += mem_feat
        b = jax.nn.softplus(proj[:, o:o + 1]); o += 1
        g = jax.nn.sigmoid(proj[:, o:o + 1]); o += 1
        s = jax.nn.softmax(proj[:, o:o + shift_width], axis=-1); o += shift_width
        r = 1.0 + jax.nn.softplus(proj[:, o:o + 1])
        dot = jnp.sum(m * k[:, None, :], axis=2)
        m_norm = jnp.maximum(jnp.sqrt(jnp.sum(m * m, axis=2)), COS_EPS)
        k_norm = jnp.maximum(jnp.sqrt(jnp.sum(k * k, axis=1, keepdims=True)), COS_EPS)
        cos = dot / (m_norm * k_norm)
        w_c = jax.nn.softmax(b * cos, axis=1)
        w_g = w_c + (1.0 - g) * w
        n = w_g.shape[1]
        w_unrolled = jnp.concatenate(
            [w_g[:, n - max_shift:], w_g, w_g[:, :max_shift]], axis=1)
        w_s = sum(w_unrolled[:, j:j + n] * s[:, j:j + 1] for j in range(shift_width))
        w_s = jnp.maximum(w_s, EPSILON)   # same (non-binding) guard as kernel
        w_pow = w_s ** r
        w = w_pow / (jnp.sum(w_pow, axis=1, keepdims=True) + EPSILON)
        outs.append(w)
    return jnp.stack(outs, axis=0)


if __name__ == "__main__":
    # Module hyper-parameters (small, consistent with the forward pass)
    hidden_size = 32
    memory_size = 8
    memory_feature_size = 16
    max_shift_size = 1
    batch = 2
    timesteps = 4
    proj_size = memory_feature_size + 1 + 1 + (2 * max_shift_size + 1) + 1  # 22

    key = jax.random.PRNGKey(0)
    k1, k2, k3, k4 = jax.random.split(key, 4)

    # Deterministic "parameters" (nn.Linear default init range 1/sqrt(fan_in))
    bound = 1.0 / jnp.sqrt(hidden_size)
    W = jax.random.uniform(k1, (hidden_size, proj_size), jnp.float32, -bound, bound)
    bias = jax.random.uniform(k2, (1, proj_size), jnp.float32, -bound, bound)

    # Inputs: controller hidden states over T steps, memory m, reset() weights
    h_seq = jax.random.normal(k3, (timesteps, batch, hidden_size), jnp.float32)
    m = jax.random.normal(k4, (batch, memory_size, memory_feature_size), jnp.float32)
    w_init = jnp.zeros((batch, memory_size), jnp.float32)

    out = head_forward_rollout(h_seq, W, bias, m, w_init,
                               mem_feat=memory_feature_size,
                               max_shift=max_shift_size)
    out = jax.block_until_ready(out)

    ref = head_reference_rollout(h_seq, W, bias, m, w_init,
                                 mem_feat=memory_feature_size,
                                 max_shift=max_shift_size)

    assert out.shape == (timesteps, batch, memory_size)
    assert bool(jnp.all(jnp.isfinite(out)))
    max_err = float(jnp.max(jnp.abs(out - ref)))
    # tolerance covers the approximate EUP reciprocals used for the (hoisted,
    # non-recurrent) softmax denominators
    assert max_err < 2e-3, f"max abs err {max_err}"

    print("KERNEL_OK")
</pallas_src>

<mosaic_0001>
module attributes {stable_mosaic.version = 11 : i64} {
  func.func @ntm_head_kernel(%arg0: i32, %arg1: memref<4x8x33xf32, #tpu.memory_space<vmem>>, %arg2: memref<33x22xf32, #tpu.memory_space<vmem>>, %arg3: memref<8x8x16xf32, #tpu.memory_space<vmem>>, %arg4: memref<8x8xf32, #tpu.memory_space<vmem>>, %arg5: memref<4x8x8xf32, #tpu.memory_space<vmem>>) attributes {dimension_semantics = [#tpu.dimension_semantics<parallel>], iteration_bounds = array<i64: 1>, scalar_prefetch = 0 : i64, scratch_operands = 0 : i64, tpu.core_type = #tpu.core_type<tc>, window_params = [{transform_indices = @transform_0, window_bounds = array<i64: 4, 8, 33>}, {pipeline_mode = #tpu.pipeline_mode<synchronous>, transform_indices = @transform_1, window_bounds = array<i64: 33, 22>}, {transform_indices = @transform_2, window_bounds = array<i64: 8, 8, 16>}, {transform_indices = @transform_3, window_bounds = array<i64: 8, 8>}, {transform_indices = @transform_4, window_bounds = array<i64: 4, 8, 8>}]} {
    %c0 = arith.constant 0 : index
    %c0_0 = arith.constant 0 : index
    %c0_1 = arith.constant 0 : index
    %0 = vector.load %arg1[%c0, %c0_0, %c0_1] : memref<4x8x33xf32, #tpu.memory_space<vmem>>, vector<4x8x33xf32>
    %1 = vector.shape_cast %0 : vector<4x8x33xf32> to vector<32x33xf32>
    %c0_2 = arith.constant 0 : index
    %c0_3 = arith.constant 0 : index
    %2 = vector.load %arg2[%c0_2, %c0_3] : memref<33x22xf32, #tpu.memory_space<vmem>>, vector<33x22xf32>
    %cst = arith.constant dense<0.000000e+00> : vector<32x22xf32>
    %3 = tpu.matmul %1, %2, %cst {dimension_numbers = #tpu.dot_dimension_numbers<[1], [0], [0], [1], [0, 0, 1, 1], [], []>} : vector<32x33xf32>, vector<33x22xf32>, vector<32x22xf32> -> vector<32x22xf32>
    %4 = vector.extract_strided_slice %3 {offsets = [0, 0], sizes = [32, 16], strides = [1, 1]} : vector<32x22xf32> to vector<32x16xf32>
    %5 = math.tanh %4 : vector<32x16xf32>
    %6 = vector.extract_strided_slice %3 {offsets = [0, 16], sizes = [32, 1], strides = [1, 1]} : vector<32x22xf32> to vector<32x1xf32>
    %cst_4 = arith.constant 0.000000e+00 : f32
    %7 = vector.broadcast %cst_4 : f32 to vector<32x1xf32>
    %8 = arith.maximumf %6, %7 : vector<32x1xf32>
    %9 = vector.broadcast %cst_4 : f32 to vector<32x1xf32>
    %10 = arith.subf %6, %9 : vector<32x1xf32>
    %11 = arith.cmpf one, %10, %10 : vector<32x1xf32>
    %12 = vector.broadcast %cst_4 : f32 to vector<32x1xf32>
    %13 = arith.addf %6, %12 : vector<32x1xf32>
    %14 = math.absf %10 : vector<32x1xf32>
    %cst_5 = arith.constant 0.000000e+00 : f32
    %15 = vector.broadcast %cst_5 : f32 to vector<32x1xf32>
    %16 = arith.subf %15, %14 : vector<32x1xf32>
    %17 = math.exp %16 : vector<32x1xf32>
    %18 = math.log1p %17 : vector<32x1xf32>
    %19 = arith.addf %8, %18 : vector<32x1xf32>
    %20 = arith.select %11, %13, %19 : vector<32x1xi1>, vector<32x1xf32>
    %21 = vector.extract_strided_slice %3 {offsets = [0, 17], sizes = [32, 1], strides = [1, 1]} : vector<32x22xf32> to vector<32x1xf32>
    %22 = arith.negf %21 : vector<32x1xf32>
    %23 = math.exp %22 : vector<32x1xf32>
    %cst_6 = arith.constant 1.000000e+00 : f32
    %24 = vector.broadcast %cst_6 : f32 to vector<32x1xf32>
    %25 = arith.addf %24, %23 : vector<32x1xf32>
    %26 = arith.divf %24, %25 : vector<32x1xf32>
    %27 = vector.extract_strided_slice %3 {offsets = [0, 18], sizes = [32, 3], strides = [1, 1]} : vector<32x22xf32> to vector<32x3xf32>
    %28 = vector.extract_strided_slice %3 {offsets = [0, 21], sizes = [32, 1], strides = [1, 1]} : vector<32x22xf32> to vector<32x1xf32>
    %cst_7 = arith.constant 0.000000e+00 : f32
    %29 = vector.broadcast %cst_7 : f32 to vector<32x1xf32>
    %30 = arith.maximumf %28, %29 : vector<32x1xf32>
    %31 = vector.broadcast %cst_7 : f32 to vector<32x1xf32>
    %32 = arith.subf %28, %31 : vector<32x1xf32>
    %33 = arith.cmpf one, %32, %32 : vector<32x1xf32>
    %34 = vector.broadcast %cst_7 : f32 to vector<32x1xf32>
    %35 = arith.addf %28, %34 : vector<32x1xf32>
    %36 = math.absf %32 : vector<32x1xf32>
    %cst_8 = arith.constant 0.000000e+00 : f32
    %37 = vector.broadcast %cst_8 : f32 to vector<32x1xf32>
    %38 = arith.subf %37, %36 : vector<32x1xf32>
    %39 = math.exp %38 : vector<32x1xf32>
    %40 = math.log1p %39 : vector<32x1xf32>
    %41 = arith.addf %30, %40 : vector<32x1xf32>
    %42 = arith.select %33, %35, %41 : vector<32x1xi1>, vector<32x1xf32>
    %cst_9 = arith.constant 1.000000e+00 : f32
    %43 = vector.broadcast %cst_9 : f32 to vector<32x1xf32>
    %44 = arith.addf %43, %42 : vector<32x1xf32>
    %cst_10 = arith.constant dense<0xFF800000> : vector<32xf32>
    %45 = vector.multi_reduction <maximumf>, %27, %cst_10 [1] : vector<32x3xf32> to vector<32xf32>
    %46 = vector.shape_cast %45 : vector<32xf32> to vector<32x1xf32>
    %47 = vector.broadcast %46 : vector<32x1xf32> to vector<32x3xf32>
    %48 = arith.subf %27, %47 : vector<32x3xf32>
    %49 = math.exp %48 : vector<32x3xf32>
    %cst_11 = arith.constant dense<0.000000e+00> : vector<32xf32>
    %50 = vector.multi_reduction <add>, %49, %cst_11 [1] : vector<32x3xf32> to vector<32xf32>
    %51 = vector.shape_cast %50 : vector<32xf32> to vector<32x1xf32>
    %52 = tpu.reciprocal %51 {approx = true} : vector<32x1xf32> -> vector<32x1xf32>
    %53 = vector.broadcast %52 : vector<32x1xf32> to vector<32x3xf32>
    %54 = arith.mulf %49, %53 : vector<32x3xf32>
    %c0_12 = arith.constant 0 : index
    %c0_13 = arith.constant 0 : index
    %c0_14 = arith.constant 0 : index
    %55 = vector.load %arg3[%c0_12, %c0_13, %c0_14] : memref<8x8x16xf32, #tpu.memory_space<vmem>>, vector<8x8x16xf32>
    %56 = arith.mulf %55, %55 : vector<8x8x16xf32>
    %cst_15 = arith.constant dense<0.000000e+00> : vector<8x8xf32>
    %57 = vector.multi_reduction <add>, %56, %cst_15 [2] : vector<8x8x16xf32> to vector<8x8xf32>
    %cst_16 = arith.constant 1.000000e-16 : f32
    %58 = vector.broadcast %cst_16 : f32 to vector<8x8xf32>
    %59 = arith.maximumf %57, %58 : vector<8x8xf32>
    %60 = math.rsqrt %59 : vector<8x8xf32>
    %61 = vector.extract_strided_slice %5 {offsets = [0, 0], sizes = [8, 16], strides = [1, 1]} : vector<32x16xf32> to vector<8x16xf32>
    %62 = vector.extract_strided_slice %20 {offsets = [0, 0], sizes = [8, 1], strides = [1, 1]} : vector<32x1xf32> to vector<8x1xf32>
    %63 = vector.shape_cast %61 : vector<8x16xf32> to vector<8x1x16xf32>
    %64 = vector.broadcast %63 : vector<8x1x16xf32> to vector<8x8x16xf32>
    %65 = arith.mulf %55, %64 : vector<8x8x16xf32>
    %cst_17 = arith.constant dense<0.000000e+00> : vector<8x8xf32>
    %66 = vector.multi_reduction <add>, %65, %cst_17 [2] : vector<8x8x16xf32> to vector<8x8xf32>
    %67 = arith.mulf %61, %61 : vector<8x16xf32>
    %cst_18 = arith.constant dense<0.000000e+00> : vector<8xf32>
    %68 = vector.multi_reduction <add>, %67, %cst_18 [1] : vector<8x16xf32> to vector<8xf32>
    %69 = vector.shape_cast %68 : vector<8xf32> to vector<8x1xf32>
    %cst_19 = arith.constant 1.000000e-16 : f32
    %70 = vector.broadcast %cst_19 : f32 to vector<8x1xf32>
    %71 = arith.maximumf %69, %70 : vector<8x1xf32>
    %72 = math.rsqrt %71 : vector<8x1xf32>
    %73 = arith.mulf %66, %60 : vector<8x8xf32>
    %74 = vector.broadcast %72 : vector<8x1xf32> to vector<8x8xf32>
    %75 = arith.mulf %73, %74 : vector<8x8xf32>
    %76 = vector.broadcast %62 : vector<8x1xf32> to vector<8x8xf32>
    %77 = arith.mulf %76, %75 : vector<8x8xf32>
    %cst_20 = arith.constant dense<0xFF800000> : vector<8xf32>
    %78 = vector.multi_reduction <maximumf>, %77, %cst_20 [1] : vector<8x8xf32> to vector<8xf32>
    %79 = vector.shape_cast %78 : vector<8xf32> to vector<8x1xf32>
    %80 = vector.broadcast %79 : vector<8x1xf32> to vector<8x8xf32>
    %81 = arith.subf %77, %80 : vector<8x8xf32>
    %82 = math.exp %81 : vector<8x8xf32>
    %cst_21 = arith.constant dense<0.000000e+00> : vector<8xf32>
    %83 = vector.multi_reduction <add>, %82, %cst_21 [1] : vector<8x8xf32> to vector<8xf32>
    %84 = vector.shape_cast %83 : vector<8xf32> to vector<8x1xf32>
    %85 = tpu.reciprocal %84 {approx = true} : vector<8x1xf32> -> vector<8x1xf32>
    %86 = vector.broadcast %85 : vector<8x1xf32> to vector<8x8xf32>
    %87 = arith.mulf %82, %86 : vector<8x8xf32>
    %88 = vector.extract_strided_slice %5 {offsets = [8, 0], sizes = [8, 16], strides = [1, 1]} : vector<32x16xf32> to vector<8x16xf32>
    %89 = vector.extract_strided_slice %20 {offsets = [8, 0], sizes = [8, 1], strides = [1, 1]} : vector<32x1xf32> to vector<8x1xf32>
    %90 = vector.shape_cast %88 : vector<8x16xf32> to vector<8x1x16xf32>
    %91 = vector.broadcast %90 : vector<8x1x16xf32> to vector<8x8x16xf32>
    %92 = arith.mulf %55, %91 : vector<8x8x16xf32>
    %cst_22 = arith.constant dense<0.000000e+00> : vector<8x8xf32>
    %93 = vector.multi_reduction <add>, %92, %cst_22 [2] : vector<8x8x16xf32> to vector<8x8xf32>
    %94 = arith.mulf %88, %88 : vector<8x16xf32>
    %cst_23 = arith.constant dense<0.000000e+00> : vector<8xf32>
    %95 = vector.multi_reduction <add>, %94, %cst_23 [1] : vector<8x16xf32> to vector<8xf32>
    %96 = vector.shape_cast %95 : vector<8xf32> to vector<8x1xf32>
    %cst_24 = arith.constant 1.000000e-16 : f32
    %97 = vector.broadcast %cst_24 : f32 to vector<8x1xf32>
    %98 = arith.maximumf %96, %97 : vector<8x1xf32>
    %99 = math.rsqrt %98 : vector<8x1xf32>
    %100 = arith.mulf %93, %60 : vector<8x8xf32>
    %101 = vector.broadcast %99 : vector<8x1xf32> to vector<8x8xf32>
    %102 = arith.mulf %100, %101 : vector<8x8xf32>
    %103 = vector.broadcast %89 : vector<8x1xf32> to vector<8x8xf32>
    %104 = arith.mulf %103, %102 : vector<8x8xf32>
    %cst_25 = arith.constant dense<0xFF800000> : vector<8xf32>
    %105 = vector.multi_reduction <maximumf>, %104, %cst_25 [1] : vector<8x8xf32> to vector<8xf32>
    %106 = vector.shape_cast %105 : vector<8xf32> to vector<8x1xf32>
    %107 = vector.broadcast %106 : vector<8x1xf32> to vector<8x8xf32>
    %108 = arith.subf %104, %107 : vector<8x8xf32>
    %109 = math.exp %108 : vector<8x8xf32>
    %cst_26 = arith.constant dense<0.000000e+00> : vector<8xf32>
    %110 = vector.multi_reduction <add>, %109, %cst_26 [1] : vector<8x8xf32> to vector<8xf32>
    %111 = vector.shape_cast %110 : vector<8xf32> to vector<8x1xf32>
    %112 = tpu.reciprocal %111 {approx = true} : vector<8x1xf32> -> vector<8x1xf32>
    %113 = vector.broadcast %112 : vector<8x1xf32> to vector<8x8xf32>
    %114 = arith.mulf %109, %113 : vector<8x8xf32>
    %115 = vector.extract_strided_slice %5 {offsets = [16, 0], sizes = [8, 16], strides = [1, 1]} : vector<32x16xf32> to vector<8x16xf32>
    %116 = vector.extract_strided_slice %20 {offsets = [16, 0], sizes = [8, 1], strides = [1, 1]} : vector<32x1xf32> to vector<8x1xf32>
    %117 = vector.shape_cast %115 : vector<8x16xf32> to vector<8x1x16xf32>
    %118 = vector.broadcast %117 : vector<8x1x16xf32> to vector<8x8x16xf32>
    %119 = arith.mulf %55, %118 : vector<8x8x16xf32>
    %cst_27 = arith.constant dense<0.000000e+00> : vector<8x8xf32>
    %120 = vector.multi_reduction <add>, %119, %cst_27 [2] : vector<8x8x16xf32> to vector<8x8xf32>
    %121 = arith.mulf %115, %115 : vector<8x16xf32>
    %cst_28 = arith.constant dense<0.000000e+00> : vector<8xf32>
    %122 = vector.multi_reduction <add>, %121, %cst_28 [1] : vector<8x16xf32> to vector<8xf32>
    %123 = vector.shape_cast %122 : vector<8xf32> to vector<8x1xf32>
    %cst_29 = arith.constant 1.000000e-16 : f32
    %124 = vector.broadcast %cst_29 : f32 to vector<8x1xf32>
    %125 = arith.maximumf %123, %124 : vector<8x1xf32>
    %126 = math.rsqrt %125 : vector<8x1xf32>
    %127 = arith.mulf %120, %60 : vector<8x8xf32>
    %128 = vector.broadcast %126 : vector<8x1xf32> to vector<8x8xf32>
    %129 = arith.mulf %127, %128 : vector<8x8xf32>
    %130 = vector.broadcast %116 : vector<8x1xf32> to vector<8x8xf32>
    %131 = arith.mulf %130, %129 : vector<8x8xf32>
    %cst_30 = arith.constant dense<0xFF800000> : vector<8xf32>
    %132 = vector.multi_reduction <maximumf>, %131, %cst_30 [1] : vector<8x8xf32> to vector<8xf32>
    %133 = vector.shape_cast %132 : vector<8xf32> to vector<8x1xf32>
    %134 = vector.broadcast %133 : vector<8x1xf32> to vector<8x8xf32>
    %135 = arith.subf %131, %134 : vector<8x8xf32>
    %136 = math.exp %135 : vector<8x8xf32>
    %cst_31 = arith.constant dense<0.000000e+00> : vector<8xf32>
    %137 = vector.multi_reduction <add>, %136, %cst_31 [1] : vector<8x8xf32> to vector<8xf32>
    %138 = vector.shape_cast %137 : vector<8xf32> to vector<8x1xf32>
    %139 = tpu.reciprocal %138 {approx = true} : vector<8x1xf32> -> vector<8x1xf32>
    %140 = vector.broadcast %139 : vector<8x1xf32> to vector<8x8xf32>
    %141 = arith.mulf %136, %140 : vector<8x8xf32>
    %142 = vector.extract_strided_slice %5 {offsets = [24, 0], sizes = [8, 16], strides = [1, 1]} : vector<32x16xf32> to vector<8x16xf32>
    %143 = vector.extract_strided_slice %20 {offsets = [24, 0], sizes = [8, 1], strides = [1, 1]} : vector<32x1xf32> to vector<8x1xf32>
    %144 = vector.shape_cast %142 : vector<8x16xf32> to vector<8x1x16xf32>
    %145 = vector.broadcast %144 : vector<8x1x16xf32> to vector<8x8x16xf32>
    %146 = arith.mulf %55, %145 : vector<8x8x16xf32>
    %cst_32 = arith.constant dense<0.000000e+00> : vector<8x8xf32>
    %147 = vector.multi_reduction <add>, %146, %cst_32 [2] : vector<8x8x16xf32> to vector<8x8xf32>
    %148 = arith.mulf %142, %142 : vector<8x16xf32>
    %cst_33 = arith.constant dense<0.000000e+00> : vector<8xf32>
    %149 = vector.multi_reduction <add>, %148, %cst_33 [1] : vector<8x16xf32> to vector<8xf32>
    %150 = vector.shape_cast %149 : vector<8xf32> to vector<8x1xf32>
    %cst_34 = arith.constant 1.000000e-16 : f32
    %151 = vector.broadcast %cst_34 : f32 to vector<8x1xf32>
    %152 = arith.maximumf %150, %151 : vector<8x1xf32>
    %153 = math.rsqrt %152 : vector<8x1xf32>
    %154 = arith.mulf %147, %60 : vector<8x8xf32>
    %155 = vector.broadcast %153 : vector<8x1xf32> to vector<8x8xf32>
    %156 = arith.mulf %154, %155 : vector<8x8xf32>
    %157 = vector.broadcast %143 : vector<8x1xf32> to vector<8x8xf32>
    %158 = arith.mulf %157, %156 : vector<8x8xf32>
    %cst_35 = arith.constant dense<0xFF800000> : vector<8xf32>
    %159 = vector.multi_reduction <maximumf>, %158, %cst_35 [1] : vector<8x8xf32> to vector<8xf32>
    %160 = vector.shape_cast %159 : vector<8xf32> to vector<8x1xf32>
    %161 = vector.broadcast %160 : vector<8x1xf32> to vector<8x8xf32>
    %162 = arith.subf %158, %161 : vector<8x8xf32>
    %163 = math.exp %162 : vector<8x8xf32>
    %cst_36 = arith.constant dense<0.000000e+00> : vector<8xf32>
    %164 = vector.multi_reduction <add>, %163, %cst_36 [1] : vector<8x8xf32> to vector<8xf32>
    %165 = vector.shape_cast %164 : vector<8xf32> to vector<8x1xf32>
    %166 = tpu.reciprocal %165 {approx = true} : vector<8x1xf32> -> vector<8x1xf32>
    %167 = vector.broadcast %166 : vector<8x1xf32> to vector<8x8xf32>
    %168 = arith.mulf %163, %167 : vector<8x8xf32>
    %c0_37 = arith.constant 0 : index
    %c0_38 = arith.constant 0 : index
    %169 = vector.load %arg4[%c0_37, %c0_38] : memref<8x8xf32, #tpu.memory_space<vmem>>, vector<8x8xf32>
    %170 = vector.extract_strided_slice %26 {offsets = [0, 0], sizes = [8, 1], strides = [1, 1]} : vector<32x1xf32> to vector<8x1xf32>
    %171 = vector.extract_strided_slice %54 {offsets = [0, 0], sizes = [8, 3], strides = [1, 1]} : vector<32x3xf32> to vector<8x3xf32>
    %172 = vector.extract_strided_slice %44 {offsets = [0, 0], sizes = [8, 1], strides = [1, 1]} : vector<32x1xf32> to vector<8x1xf32>
    %cst_39 = arith.constant 1.000000e+00 : f32
    %173 = vector.broadcast %cst_39 : f32 to vector<8x1xf32>
    %174 = arith.subf %173, %170 : vector<8x1xf32>
    %175 = vector.broadcast %174 : vector<8x1xf32> to vector<8x8xf32>
    %176 = arith.mulf %175, %169 : vector<8x8xf32>
    %177 = arith.addf %87, %176 : vector<8x8xf32>
    %178 = vector.extract_strided_slice %177 {offsets = [0, 7], sizes = [8, 1], strides = [1, 1]} : vector<8x8xf32> to vector<8x1xf32>
    %179 = vector.extract_strided_slice %177 {offsets = [0, 0], sizes = [8, 1], strides = [1, 1]} : vector<8x8xf32> to vector<8x1xf32>
    %180 = tpu.concatenate %178, %177, %179 in 1 : vector<8x1xf32>, vector<8x8xf32>, vector<8x1xf32> -> vector<8x10xf32>
    %cst_40 = arith.constant 0.000000e+00 : f32
    %181 = vector.broadcast %cst_40 : f32 to vector<8x8xf32>
    %182 = vector.extract_strided_slice %180 {offsets = [0, 0], sizes = [8, 8], strides = [1, 1]} : vector<8x10xf32> to vector<8x8xf32>
    %183 = vector.extract_strided_slice %171 {offsets = [0, 0], sizes = [8, 1], strides = [1, 1]} : vector<8x3xf32> to vector<8x1xf32>
    %184 = vector.broadcast %183 : vector<8x1xf32> to vector<8x8xf32>
    %185 = arith.mulf %182, %184 : vector<8x8xf32>
    %186 = arith.addf %181, %185 : vector<8x8xf32>
    %187 = vector.extract_strided_slice %180 {offsets = [0, 1], sizes = [8, 8], strides = [1, 1]} : vector<8x10xf32> to vector<8x8xf32>
    %188 = vector.extract_strided_slice %171 {offsets = [0, 1], sizes = [8, 1], strides = [1, 1]} : vector<8x3xf32> to vector<8x1xf32>
    %189 = vector.broadcast %188 : vector<8x1xf32> to vector<8x8xf32>
    %190 = arith.mulf %187, %189 : vector<8x8xf32>
    %191 = arith.addf %186, %190 : vector<8x8xf32>
    %192 = vector.extract_strided_slice %180 {offsets = [0, 2], sizes = [8, 8], strides = [1, 1]} : vector<8x10xf32> to vector<8x8xf32>
    %193 = vector.extract_strided_slice %171 {offsets = [0, 2], sizes = [8, 1], strides = [1, 1]} : vector<8x3xf32> to vector<8x1xf32>
    %194 = vector.broadcast %193 : vector<8x1xf32> to vector<8x8xf32>
    %195 = arith.mulf %192, %194 : vector<8x8xf32>
    %196 = arith.addf %191, %195 : vector<8x8xf32>
    %cst_41 = arith.constant 9.99999997E-7 : f32
    %197 = vector.broadcast %cst_41 : f32 to vector<8x8xf32>
    %198 = arith.maximumf %196, %197 : vector<8x8xf32>
    %199 = vector.broadcast %172 : vector<8x1xf32> to vector<8x8xf32>
    %200 = math.powf %198, %199 : vector<8x8xf32>
    %cst_42 = arith.constant dense<0.000000e+00> : vector<8xf32>
    %201 = vector.multi_reduction <add>, %200, %cst_42 [1] : vector<8x8xf32> to vector<8xf32>
    %202 = vector.shape_cast %201 : vector<8xf32> to vector<8x1xf32>
    %cst_43 = arith.constant 9.99999997E-7 : f32
    %203 = vector.broadcast %cst_43 : f32 to vector<8x1xf32>
    %204 = arith.addf %202, %203 : vector<8x1xf32>
    %205 = vector.broadcast %204 : vector<8x1xf32> to vector<8x8xf32>
    %206 = arith.divf %200, %205 : vector<8x8xf32>
    %c0_44 = arith.constant 0 : index
    %c0_45 = arith.constant 0 : index
    %c0_46 = arith.constant 0 : index
    %207 = vector.load %arg5[%c0_44, %c0_45, %c0_46] : memref<4x8x8xf32, #tpu.memory_space<vmem>>, vector<1x8x8xf32>
    %208 = vector.shape_cast %207 : vector<1x8x8xf32> to vector<8x8xf32>
    %209 = vector.shape_cast %206 : vector<8x8xf32> to vector<1x8x8xf32>
    tpu.vector_store %arg5[%c0_44, %c0_45, %c0_46], %209 {strides = array<i32>} : memref<4x8x8xf32, #tpu.memory_space<vmem>>, vector<1x8x8xf32>,
    %210 = vector.extract_strided_slice %26 {offsets = [8, 0], sizes = [8, 1], strides = [1, 1]} : vector<32x1xf32> to vector<8x1xf32>
    %211 = vector.extract_strided_slice %54 {offsets = [8, 0], sizes = [8, 3], strides = [1, 1]} : vector<32x3xf32> to vector<8x3xf32>
    %212 = vector.extract_strided_slice %44 {offsets = [8, 0], sizes = [8, 1], strides = [1, 1]} : vector<32x1xf32> to vector<8x1xf32>
    %cst_47 = arith.constant 1.000000e+00 : f32
    %213 = vector.broadcast %cst_47 : f32 to vector<8x1xf32>
    %214 = arith.subf %213, %210 : vector<8x1xf32>
    %215 = vector.broadcast %214 : vector<8x1xf32> to vector<8x8xf32>
    %216 = arith.mulf %215, %206 : vector<8x8xf32>
    %217 = arith.addf %114, %216 : vector<8x8xf32>
    %218 = vector.extract_strided_slice %217 {offsets = [0, 7], sizes = [8, 1], strides = [1, 1]} : vector<8x8xf32> to vector<8x1xf32>
    %219 = vector.extract_strided_slice %217 {offsets = [0, 0], sizes = [8, 1], strides = [1, 1]} : vector<8x8xf32> to vector<8x1xf32>
    %220 = tpu.concatenate %218, %217, %219 in 1 : vector<8x1xf32>, vector<8x8xf32>, vector<8x1xf32> -> vector<8x10xf32>
    %cst_48 = arith.constant 0.000000e+00 : f32
    %221 = vector.broadcast %cst_48 : f32 to vector<8x8xf32>
    %222 = vector.extract_strided_slice %220 {offsets = [0, 0], sizes = [8, 8], strides = [1, 1]} : vector<8x10xf32> to vector<8x8xf32>
    %223 = vector.extract_strided_slice %211 {offsets = [0, 0], sizes = [8, 1], strides = [1, 1]} : vector<8x3xf32> to vector<8x1xf32>
    %224 = vector.broadcast %223 : vector<8x1xf32> to vector<8x8xf32>
    %225 = arith.mulf %222, %224 : vector<8x8xf32>
    %226 = arith.addf %221, %225 : vector<8x8xf32>
    %227 = vector.extract_strided_slice %220 {offsets = [0, 1], sizes = [8, 8], strides = [1, 1]} : vector<8x10xf32> to vector<8x8xf32>
    %228 = vector.extract_strided_slice %211 {offsets = [0, 1], sizes = [8, 1], strides = [1, 1]} : vector<8x3xf32> to vector<8x1xf32>
    %229 = vector.broadcast %228 : vector<8x1xf32> to vector<8x8xf32>
    %230 = arith.mulf %227, %229 : vector<8x8xf32>
    %231 = arith.addf %226, %230 : vector<8x8xf32>
    %232 = vector.extract_strided_slice %220 {offsets = [0, 2], sizes = [8, 8], strides = [1, 1]} : vector<8x10xf32> to vector<8x8xf32>
    %233 = vector.extract_strided_slice %211 {offsets = [0, 2], sizes = [8, 1], strides = [1, 1]} : vector<8x3xf32> to vector<8x1xf32>
    %234 = vector.broadcast %233 : vector<8x1xf32> to vector<8x8xf32>
    %235 = arith.mulf %232, %234 : vector<8x8xf32>
    %236 = arith.addf %231, %235 : vector<8x8xf32>
    %cst_49 = arith.constant 9.99999997E-7 : f32
    %237 = vector.broadcast %cst_49 : f32 to vector<8x8xf32>
    %238 = arith.maximumf %236, %237 : vector<8x8xf32>
    %239 = vector.broadcast %212 : vector<8x1xf32> to vector<8x8xf32>
    %240 = math.powf %238, %239 : vector<8x8xf32>
    %cst_50 = arith.constant dense<0.000000e+00> : vector<8xf32>
    %241 = vector.multi_reduction <add>, %240, %cst_50 [1] : vector<8x8xf32> to vector<8xf32>
    %242 = vector.shape_cast %241 : vector<8xf32> to vector<8x1xf32>
    %cst_51 = arith.constant 9.99999997E-7 : f32
    %243 = vector.broadcast %cst_51 : f32 to vector<8x1xf32>
    %244 = arith.addf %242, %243 : vector<8x1xf32>
    %245 = vector.broadcast %244 : vector<8x1xf32> to vector<8x8xf32>
    %246 = arith.divf %240, %245 : vector<8x8xf32>
    %c1 = arith.constant 1 : index
    %c0_52 = arith.constant 0 : index
    %c0_53 = arith.constant 0 : index
    %247 = vector.load %arg5[%c1, %c0_52, %c0_53] : memref<4x8x8xf32, #tpu.memory_space<vmem>>, vector<1x8x8xf32>
    %248 = vector.shape_cast %247 : vector<1x8x8xf32> to vector<8x8xf32>
    %249 = vector.shape_cast %246 : vector<8x8xf32> to vector<1x8x8xf32>
    tpu.vector_store %arg5[%c1, %c0_52, %c0_53], %249 {strides = array<i32>} : memref<4x8x8xf32, #tpu.memory_space<vmem>>, vector<1x8x8xf32>,
    %250 = vector.extract_strided_slice %26 {offsets = [16, 0], sizes = [8, 1], strides = [1, 1]} : vector<32x1xf32> to vector<8x1xf32>
    %251 = vector.extract_strided_slice %54 {offsets = [16, 0], sizes = [8, 3], strides = [1, 1]} : vector<32x3xf32> to vector<8x3xf32>
    %252 = vector.extract_strided_slice %44 {offsets = [16, 0], sizes = [8, 1], strides = [1, 1]} : vector<32x1xf32> to vector<8x1xf32>
    %cst_54 = arith.constant 1.000000e+00 : f32
    %253 = vector.broadcast %cst_54 : f32 to vector<8x1xf32>
    %254 = arith.subf %253, %250 : vector<8x1xf32>
    %255 = vector.broadcast %254 : vector<8x1xf32> to vector<8x8xf32>
    %256 = arith.mulf %255, %246 : vector<8x8xf32>
    %257 = arith.addf %141, %256 : vector<8x8xf32>
    %258 = vector.extract_strided_slice %257 {offsets = [0, 7], sizes = [8, 1], strides = [1, 1]} : vector<8x8xf32> to vector<8x1xf32>
    %259 = vector.extract_strided_slice %257 {offsets = [0, 0], sizes = [8, 1], strides = [1, 1]} : vector<8x8xf32> to vector<8x1xf32>
    %260 = tpu.concatenate %258, %257, %259 in 1 : vector<8x1xf32>, vector<8x8xf32>, vector<8x1xf32> -> vector<8x10xf32>
    %cst_55 = arith.constant 0.000000e+00 : f32
    %261 = vector.broadcast %cst_55 : f32 to vector<8x8xf32>
    %262 = vector.extract_strided_slice %260 {offsets = [0, 0], sizes = [8, 8], strides = [1, 1]} : vector<8x10xf32> to vector<8x8xf32>
    %263 = vector.extract_strided_slice %251 {offsets = [0, 0], sizes = [8, 1], strides = [1, 1]} : vector<8x3xf32> to vector<8x1xf32>
    %264 = vector.broadcast %263 : vector<8x1xf32> to vector<8x8xf32>
    %265 = arith.mulf %262, %264 : vector<8x8xf32>
    %266 = arith.addf %261, %265 : vector<8x8xf32>
    %267 = vector.extract_strided_slice %260 {offsets = [0, 1], sizes = [8, 8], strides = [1, 1]} : vector<8x10xf32> to vector<8x8xf32>
    %268 = vector.extract_strided_slice %251 {offsets = [0, 1], sizes = [8, 1], strides = [1, 1]} : vector<8x3xf32> to vector<8x1xf32>
    %269 = vector.broadcast %268 : vector<8x1xf32> to vector<8x8xf32>
    %270 = arith.mulf %267, %269 : vector<8x8xf32>
    %271 = arith.addf %266, %270 : vector<8x8xf32>
    %272 = vector.extract_strided_slice %260 {offsets = [0, 2], sizes = [8, 8], strides = [1, 1]} : vector<8x10xf32> to vector<8x8xf32>
    %273 = vector.extract_strided_slice %251 {offsets = [0, 2], sizes = [8, 1], strides = [1, 1]} : vector<8x3xf32> to vector<8x1xf32>
    %274 = vector.broadcast %273 : vector<8x1xf32> to vector<8x8xf32>
    %275 = arith.mulf %272, %274 : vector<8x8xf32>
    %276 = arith.addf %271, %275 : vector<8x8xf32>
    %cst_56 = arith.constant 9.99999997E-7 : f32
    %277 = vector.broadcast %cst_56 : f32 to vector<8x8xf32>
    %278 = arith.maximumf %276, %277 : vector<8x8xf32>
    %279 = vector.broadcast %252 : vector<8x1xf32> to vector<8x8xf32>
    %280 = math.powf %278, %279 : vector<8x8xf32>
    %cst_57 = arith.constant dense<0.000000e+00> : vector<8xf32>
    %281 = vector.multi_reduction <add>, %280, %cst_57 [1] : vector<8x8xf32> to vector<8xf32>
    %282 = vector.shape_cast %281 : vector<8xf32> to vector<8x1xf32>
    %cst_58 = arith.constant 9.99999997E-7 : f32
    %283 = vector.broadcast %cst_58 : f32 to vector<8x1xf32>
    %284 = arith.addf %282, %283 : vector<8x1xf32>
    %285 = vector.broadcast %284 : vector<8x1xf32> to vector<8x8xf32>
    %286 = arith.divf %280, %285 : vector<8x8xf32>
    %c2 = arith.constant 2 : index
    %c0_59 = arith.constant 0 : index
    %c0_60 = arith.constant 0 : index
    %287 = vector.load %arg5[%c2, %c0_59, %c0_60] : memref<4x8x8xf32, #tpu.memory_space<vmem>>, vector<1x8x8xf32>
    %288 = vector.shape_cast %287 : vector<1x8x8xf32> to vector<8x8xf32>
    %289 = vector.shape_cast %286 : vector<8x8xf32> to vector<1x8x8xf32>
    tpu.vector_store %arg5[%c2, %c0_59, %c0_60], %289 {strides = array<i32>} : memref<4x8x8xf32, #tpu.memory_space<vmem>>, vector<1x8x8xf32>,
    %290 = vector.extract_strided_slice %26 {offsets = [24, 0], sizes = [8, 1], strides = [1, 1]} : vector<32x1xf32> to vector<8x1xf32>
    %291 = vector.extract_strided_slice %54 {offsets = [24, 0], sizes = [8, 3], strides = [1, 1]} : vector<32x3xf32> to vector<8x3xf32>
    %292 = vector.extract_strided_slice %44 {offsets = [24, 0], sizes = [8, 1], strides = [1, 1]} : vector<32x1xf32> to vector<8x1xf32>
    %cst_61 = arith.constant 1.000000e+00 : f32
    %293 = vector.broadcast %cst_61 : f32 to vector<8x1xf32>
    %294 = arith.subf %293, %290 : vector<8x1xf32>
    %295 = vector.broadcast %294 : vector<8x1xf32> to vector<8x8xf32>
    %296 = arith.mulf %295, %286 : vector<8x8xf32>
    %297 = arith.addf %168, %296 : vector<8x8xf32>
    %298 = vector.extract_strided_slice %297 {offsets = [0, 7], sizes = [8, 1], strides = [1, 1]} : vector<8x8xf32> to vector<8x1xf32>
    %299 = vector.extract_strided_slice %297 {offsets = [0, 0], sizes = [8, 1], strides = [1, 1]} : vector<8x8xf32> to vector<8x1xf32>
    %300 = tpu.concatenate %298, %297, %299 in 1 : vector<8x1xf32>, vector<8x8xf32>, vector<8x1xf32> -> vector<8x10xf32>
    %cst_62 = arith.constant 0.000000e+00 : f32
    %301 = vector.broadcast %cst_62 : f32 to vector<8x8xf32>
    %302 = vector.extract_strided_slice %300 {offsets = [0, 0], sizes = [8, 8], strides = [1, 1]} : vector<8x10xf32> to vector<8x8xf32>
    %303 = vector.extract_strided_slice %291 {offsets = [0, 0], sizes = [8, 1], strides = [1, 1]} : vector<8x3xf32> to vector<8x1xf32>
    %304 = vector.broadcast %303 : vector<8x1xf32> to vector<8x8xf32>
    %305 = arith.mulf %302, %304 : vector<8x8xf32>
    %306 = arith.addf %301, %305 : vector<8x8xf32>
    %307 = vector.extract_strided_slice %300 {offsets = [0, 1], sizes = [8, 8], strides = [1, 1]} : vector<8x10xf32> to vector<8x8xf32>
    %308 = vector.extract_strided_slice %291 {offsets = [0, 1], sizes = [8, 1], strides = [1, 1]} : vector<8x3xf32> to vector<8x1xf32>
    %309 = vector.broadcast %308 : vector<8x1xf32> to vector<8x8xf32>
    %310 = arith.mulf %307, %309 : vector<8x8xf32>
    %311 = arith.addf %306, %310 : vector<8x8xf32>
    %312 = vector.extract_strided_slice %300 {offsets = [0, 2], sizes = [8, 8], strides = [1, 1]} : vector<8x10xf32> to vector<8x8xf32>
    %313 = vector.extract_strided_slice %291 {offsets = [0, 2], sizes = [8, 1], strides = [1, 1]} : vector<8x3xf32> to vector<8x1xf32>
    %314 = vector.broadcast %313 : vector<8x1xf32> to vector<8x8xf32>
    %315 = arith.mulf %312, %314 : vector<8x8xf32>
    %316 = arith.addf %311, %315 : vector<8x8xf32>
    %cst_63 = arith.constant 9.99999997E-7 : f32
    %317 = vector.broadcast %cst_63 : f32 to vector<8x8xf32>
    %318 = arith.maximumf %316, %317 : vector<8x8xf32>
    %319 = vector.broadcast %292 : vector<8x1xf32> to vector<8x8xf32>
    %320 = math.powf %318, %319 : vector<8x8xf32>
    %cst_64 = arith.constant dense<0.000000e+00> : vector<8xf32>
    %321 = vector.multi_reduction <add>, %320, %cst_64 [1] : vector<8x8xf32> to vector<8xf32>
    %322 = vector.shape_cast %321 : vector<8xf32> to vector<8x1xf32>
    %cst_65 = arith.constant 9.99999997E-7 : f32
    %323 = vector.broadcast %cst_65 : f32 to vector<8x1xf32>
    %324 = arith.addf %322, %323 : vector<8x1xf32>
    %325 = vector.broadcast %324 : vector<8x1xf32> to vector<8x8xf32>
    %326 = arith.divf %320, %325 : vector<8x8xf32>
    %c3 = arith.constant 3 : index
    %c0_66 = arith.constant 0 : index
    %c0_67 = arith.constant 0 : index
    %327 = vector.load %arg5[%c3, %c0_66, %c0_67] : memref<4x8x8xf32, #tpu.memory_space<vmem>>, vector<1x8x8xf32>
    %328 = vector.shape_cast %327 : vector<1x8x8xf32> to vector<8x8xf32>
    %329 = vector.shape_cast %326 : vector<8x8xf32> to vector<1x8x8xf32>
    tpu.vector_store %arg5[%c3, %c0_66, %c0_67], %329 {strides = array<i32>} : memref<4x8x8xf32, #tpu.memory_space<vmem>>, vector<1x8x8xf32>,
    return
  }
  func.func @transform_0(%arg0: i32) -> (i32, i32, i32) {
    %c0_i32 = arith.constant 0 : i32
    %c0_i32_0 = arith.constant 0 : i32
    %c0_i32_1 = arith.constant 0 : i32
    return %c0_i32, %arg0, %c0_i32_0 : i32, i32, i32
  }
  func.func @transform_1(%arg0: i32) -> (i32, i32) {
    %c0_i32 = arith.constant 0 : i32
    %c0_i32_0 = arith.constant 0 : i32
    %c0_i32_1 = arith.constant 0 : i32
    return %c0_i32, %c0_i32_0 : i32, i32
  }
  func.func @transform_2(%arg0: i32) -> (i32, i32, i32) {
    %c0_i32 = arith.constant 0 : i32
    %c0_i32_0 = arith.constant 0 : i32
    %c0_i32_1 = arith.constant 0 : i32
    return %arg0, %c0_i32, %c0_i32_0 : i32, i32, i32
  }
  func.func @transform_3(%arg0: i32) -> (i32, i32) {
    %c0_i32 = arith.constant 0 : i32
    %c0_i32_0 = arith.constant 0 : i32
    return %arg0, %c0_i32 : i32, i32
  }
  func.func @transform_4(%arg0: i32) -> (i32, i32, i32) {
    %c0_i32 = arith.constant 0 : i32
    %c0_i32_0 = arith.constant 0 : i32
    %c0_i32_1 = arith.constant 0 : i32
    return %c0_i32, %arg0, %c0_i32_0 : i32, i32, i32
  }
}

</mosaic_0001>

<bundles_post_ra>
// kernel: tpu_custom_call.1
= control target key start
LH: loop header
LB: loop body
LE: loop exit
PB: predicated region body
PF: predicated region fallthrough
CT: control target
= control target key end

     0   :  { %9 = vsyncpa [#allocation3], 0  ;;  %s3083_s0 = inlined_call_operand.hbm [shape: f32[4,8,33], index: 0, kind: input, shape index: {}]   ;;  %s3084_s1 = inlined_call_operand.vmem [shape: f32[33,22], index: 1, kind: input, shape index: {}]   ;;  %s3085_s2 = inlined_call_operand.vmem [shape: f32[8,8,16], index: 2, kind: input, shape index: {}]   ;;  %s3086_s3 = inlined_call_operand.hbm [shape: f32[8,8], index: 3, kind: input, shape index: {}]   ;;  %s3087_s4 = inlined_call_operand.hbm [shape: f32[4,8,8], index: 4, kind: output, shape index: {}]  }
   0x1   :  { %10 = vsyncpa [#allocation6], 0 }
   0x2   :  { %11 = vsyncpa [#allocation4], 0  ;;  %s2251_s15 = smov [#allocation2]  }
   0x3   :  { %s17_s16 = sshll.u32 %s2251_s15, 4  ;;  %s18_s16 = int_to_ptr.vmem [resolvable:$true] %s17_s16 }
   0x4   :  { %s2193_s17 = scalar_lea.vmem %s18_s16, 512  ;;  %p2198_p1 = scmp.lt.s32.totalorder %s18_s16, %s18_s16 }
   0x5   :  { %p2194_p0 = scmp.ne.s32.totalorder %s18_s16, %s2193_s17  ;;  %p2199_p2 = scmp.lt.s32.totalorder %s2193_s17, %s2193_s17 }
   0x7   :  { %p2200_p3 = por %p2199_p2, %p2198_p1 }
   0x9   :  { %p2201_p4 = pnand %p2200_p3, %p2194_p0 }
   0xb   :  { %2204 = shalt.err (!%p2201_p4)
}
   0xc   :  { %s2252_s18 = smov 128   ;;  %s2253_s19 = smov 8  }
   0xd   :  { %23 = dma.hbm_to_vmem [thread:$0]  %s3083_s0, 512, %s18_s16, [#allocation3], %s2252_s18, %s2252_s18, %s2253_s19  }
   0xe   :  { %s2254_s22 = smov [#allocation5]  }
   0xf   :  { %s34_s23 = sshll.u32 %s2254_s22, 4  ;;  %s35_s23 = int_to_ptr.vmem [resolvable:$true] %s34_s23 }
  0x10   :  { %s2213_s24 = scalar_lea.vmem %s35_s23, 128  ;;  %p2218_p6 = scmp.lt.s32.totalorder %s35_s23, %s35_s23 }
  0x11   :  { %p2214_p5 = scmp.ne.s32.totalorder %s35_s23, %s2213_s24  ;;  %p2219_p7 = scmp.lt.s32.totalorder %s2213_s24, %s2213_s24 }
  0x13   :  { %p2220_p8 = por %p2219_p7, %p2218_p6 }
  0x15   :  { %p2221_p9 = pnand %p2220_p8, %p2214_p5 }
  0x17   :  { %2224 = shalt.err (!%p2221_p9)
}
  0x18   :  { %37 = dma.hbm_to_vmem [thread:$0]  %s3086_s3, 128, %s35_s23, [#allocation6]  }
  0x19   :  { %2245 = dma.done.wait [#allocation3], 512  }
  0x1a   :  { %2246 = vsyncadd [#allocation3], 4294966784 }
  0x1b   :  { %2247 = dma.done.wait [#allocation6], 128  }
  0x1c   :  { %2248 = vsyncadd [#allocation6], 4294967168  ;;  %vm66_vm0 = vcmask 1040384   ;;  %vm53_vm1 = vcmask 269312   ;;  %v52_v0 = vld [vmem:[%s3084_s1 + $0x20] sm:$0x1]  ;;  %v383_v29 = vlaneseq }
  0x1d   :  { %v51_v1 = vld [vmem:[%s3084_s1 + $0x18] sm:$0xff]  ;;  %1770 = vmatprep.subr.msk.mxu0 %vm66_vm0, %v52_v0  ;;  %v44_v2 = vld [vmem:[#allocation2] sm:$0xff]  ;;  %1786 = vmatprep.subr.msk.mxu1 %vm66_vm0, %v52_v0  ;;  %v50_v3 = vld [vmem:[%s3084_s1 + $0x10] sm:$0xff]  ;;  %vm337_vm2 = vcmask 130048   ;;  %v2255_v27 = vmov 1966171168  }
  0x1e   :  { %1771 = vmatpush3.msk.msra.mxu0 %vm66_vm0, %v52_v0  ;;  %1780 = vmatprep.mubr.msk.f32.mxu0 %vm53_vm1, %v44_v2  ;;  %v49_v4 = vld [vmem:[%s3084_s1 + $0x8] sm:$0xff]  ;;  %v48_v5 = vld [vmem:[%s3084_s1] sm:$0xff]  ;;  %v2340_v12 = vld [vmem:[%s3085_s2 + $0x10] sm:$0xff]  ;;  %v381_v28 = vunpack.c.l.s4 %v2255_v27  ;;  %v2376_v31 = vshrl.u32 %v383_v29, 7  ;;  %vm3097_vm5 = vcmask 171152   ;;  %vm3094_vm6 = vcmask 1041409  }
  0x1f   :  { %1772 = vmatprep.subr.mxu0 %v51_v1  ;;  %1791 = vmatpush3.msk.msra.mxu1 %vm66_vm0, %v52_v0  ;;  %v45_v6 = vld [vmem:[#allocation2 + $0x8] sm:$0xff]  ;;  %v2325_v7 = vld [vmem:[%s3085_s2] sm:$0xff]  ;;  %v2345_v13 = vld [vmem:[%s3085_s2 + $0x18] sm:$0xff]  ;;  %v331_v14 = vmul.f32 %v2340_v12, %v2340_v12  ;;  %vm3093_vm7 = vcmask 1042434   ;;  %vm3092_vm8 = vcmask 1043459   ;;  %vm3091_vm9 = vcmask 1044484  }
  0x20   :  { %1773 = vmatpush3.msra.mxu0 %v51_v1  ;;  %1787 = vmatprep.subr.mxu1 %v51_v1  ;;  %v329_v8 = vmul.f32 %v2325_v7, %v2325_v7  ;;  %v2333_v10 = vld [vmem:[%s3085_s2 + $0x8] sm:$0xff]  ;;  %v332_v15 = vmul.f32 %v2345_v13, %v2345_v13  ;;  %v2365_v22 = vld [vmem:[%s3085_s2 + $0x38] sm:$0xff]  ;;  %v382_v30 = vunpack.c.0.s8 %v381_v28  ;;  %v2381_v32 = vld [vmem:[%s3085_s2 + $0x20] sm:$0xff]  ;;  %v2398_v44 = vsub.s32 0, %v2376_v31  ;;  %s2259_s26 = smov 110   ;;  %s2264_s0 = smov 121  }
  0x21   :  { %1774 = vmatprep.subr.mxu0 %v50_v3  ;;  %1792 = vmatpush3.msra.mxu1 %v51_v1  ;;  %v330_v11 = vmul.f32 %v2333_v10, %v2333_v10  ;;  %v2354_v16 = vld [vmem:[%s3085_s2 + $0x28] sm:$0xff]  ;;  %v344_v18 = vsel %vm337_vm2, %v331_v14, 0.0  ;;  %v336_v23 = vmul.f32 %v2365_v22, %v2365_v22  ;;  %v333_v36 = vmul.f32 %v2381_v32, %v2381_v32  ;;  %v2392_v39 = vld [vmem:[%s3085_s2 + $0x30] sm:$0xff]  ;;  %s2265_s27 = smov 1   ;;  %s2266_s28 = smov 9  }
  0x22   :  { %1775 = vmatpush3.msra.mxu0 %v50_v3  ;;  %1788 = vmatprep.subr.mxu1 %v50_v3  ;;  %v338_v9 = vsel %vm337_vm2, %v329_v8, 0.0  ;;  %v347_v19 = vsel %vm337_vm2, %v332_v15, 0.0  ;;  %v334_v20 = vmul.f32 %v2354_v16, %v2354_v16  ;;  %v2384_v33 = vsub.s32 %v382_v30, %v2376_v31  ;;  %s2267_s29 = smov 127   ;;  %s2268_s30 = smov 126  }
  0x23   :  { %1776 = vmatprep.subr.mxu0 %v49_v4  ;;  %1793 = vmatpush3.msra.mxu1 %v50_v3  ;;  %v341_v17 = vsel %vm337_vm2, %v330_v11, 0.0  ;;  %v359_v24 = vsel %vm337_vm2, %v336_v23, 0.0  ;;  %v350_v45 = vsel %vm337_vm2, %v333_v36, 0.0  ;;  %v335_v46 = vmul.f32 %v2392_v39, %v2392_v39 }
  0x24   :  { %1777 = vmatpush3.msra.mxu0 %v49_v4  ;;  %1789 = vmatprep.subr.mxu1 %v49_v4  ;;  %v353_v21 = vsel %vm337_vm2, %v334_v20, 0.0  ;;  %vm3090_vm10 = vcmask 1045509   ;;  %vm3089_vm11 = vcmask 1046534   ;;  %vm3088_vm12 = vcmask 1047559  }
  0x25   :  { %1778 = vmatprep.subr.mxu0 %v48_v5  ;;  %1794 = vmatpush3.msra.mxu1 %v49_v4  ;;  %v356_v54 = vsel %vm337_vm2, %v335_v46, 0.0  ;;  %vm3099_vm13 = vcmask 64512   ;;  %vm3098_vm14 = vcmask 23552  }
  0x26   :  { %1779 = vmatpush3.msra.mxu0 %v48_v5  ;;  %1790 = vmatprep.subr.mxu1 %v48_v5 }
  0x27   :  { %1781 = vmatmul.mubr.msk.f32.vlgmr.msra.gmra.mxu0 %vm53_vm1, %v45_v6  ;;  %1795 = vmatpush3.msra.mxu1 %v48_v5 }
  0x28   :  { %339 = vadd.xlane.f32.xlu0 %v338_v9  ;;  %345 = vadd.xlane.f32.xlu1 %v344_v18 }
  0x2c   :  { %342 = vadd.xlane.f32.xlu0 %v341_v17 }
  0x30   :  { %348 = vadd.xlane.f32.xlu0 %v347_v19 }
  0x34   :  { %354 = vadd.xlane.f32.xlu0 %v353_v21  ;;  %v2256_v21 = vmov 0  }
  0x35   :  { %2025 = vset.pattern.permute.xlu0 %v2256_v21  ;;  %2024 = vset.pattern.permute.xlu1 %v2256_v21 }
  0x38   :  { %360 = vadd.xlane.f32.xlu0 %v359_v24 }
  0xb1   :  { %v340_v28 = vpop.xlane.xlu0 %339 }
  0xb5   :  { %v343_v30 = vpop.xlane.xlu0 %342 }
  0xe7   :  { %v2370_v25 = vpop.f32.mrf.mxu0 }
  0xe8   :  { %vm164_vm0 = vcmp.ne.f32.partialorder %v2370_v25, %v2370_v25 }
  0xe9   :  { %v2372_v26 = vpop.f32.mrf.mxu0 }
  0xea   :  { %2057 = vtanh.f32 %v2372_v26  ;;  %v171_v23 = vand.u32 2147483647, %v2372_v26  ;;  %vm163_vm4 = vcmp.ne.f32.partialorder %v2372_v26, %v2372_v26 }
  0xec   :  { %v175_v24 = vsub.f32 0.0, %v171_v23 }
  0xee   :  { %v179_v27 = vmul.f32 1.442695, %v175_v24  ;;  %v2257_v24 = vmov 16  }
  0xf0   :  { %2059 = vpow2.f32 %v179_v27 }
  0xf7   :  { %v2058_v34 = vpop.eup %2057 }
  0xf8   :  { %v500_v35 = vmul.f32 %v2058_v34, %v2058_v34  ;;  %v386_v37 = vrot.slane %v2058_v34, %v2384_v33  ;;  %v379_v38 = vcombine.high %v2058_v34, %v2058_v34 }
  0xfa   :  { %v501_v40 = vsel %vm337_vm2, %v500_v35, 0.0  ;;  %v394_v41 = vcombine.high %v386_v37, %v386_v37  ;;  %v402_v42 = vrot.slane %v386_v37, %v2384_v33  ;;  %v393_v43 = vrot.slane %v379_v38, %v2384_v33  ;;  %v346_v35 = vpop.xlane.xlu1 %345  ;;  %v349_v38 = vpop.xlane.xlu0 %348 }
  0xfb   :  { %502 = vadd.xlane.f32.xlu1 %v501_v40  ;;  %v362_v37 = vmax.f32 %v340_v28, 1e-16  ;;  %v363_v40 = vmax.f32 %v343_v30, 1e-16  ;;  %v364_v46 = vmax.f32 %v346_v35, 1e-16 }
  0xfc   :  { %v416_v47 = vrot.slane %v394_v41, %v2384_v33  ;;  %v395_v48 = vcombine.high %v393_v43, %v393_v43  ;;  %v431_v49 = vrot.slane %v402_v42, %v2398_v44  ;;  %v424_v50 = vcombine.high %v402_v42, %v402_v42 }
  0xfd   :  { %v409_v59 = vrot.slane %v393_v43, %v2384_v33  ;;  %v2060_v34 = vpop.eup %2059 }
  0xfe   :  { %v435_v51 = vrot.slane %v416_v47, %v2398_v44  ;;  %v426_v52 = vcombine.high %v416_v47, %v416_v47  ;;  %v423_v53 = vrot.slane %v395_v48, %v2384_v33  ;;  %v468_v57 = vmul.f32 %v431_v49, %v2325_v7  ;;  %v355_v43 = vpop.xlane.xlu0 %354 }
  0xff   :  { %351 = vadd.xlane.f32.xlu1 %v350_v45  ;;  %v439_v58 = vrot.slane %v424_v50, %v2398_v44  ;;  %v447_v1 = vrot.slane %v409_v59, %v2398_v44  ;;  %v425_v2 = vcombine.high %v409_v59, %v409_v59  ;;  %v187_v36 = vadd.f32 1.0, %v2060_v34 }
 0x100   :  { %v469_v55 = vmul.f32 %v435_v51, %v2333_v10  ;;  %v443_v56 = vrot.slane %v426_v52, %v2398_v44  ;;  %v451_v62 = vrot.slane %v423_v53, %v2398_v44  ;;  %v427_v63 = vcombine.high %v423_v53, %v423_v53 }
 0x101   :  { %v476_v0 = vsel %vm337_vm2, %v468_v57, 0.0  ;;  %v470_v4 = vmul.f32 %v439_v58, %v2340_v12  ;;  %v472_v8 = vmul.f32 %v447_v1, %v2381_v32  ;;  %v455_v15 = vrot.slane %v425_v2, %v2398_v44 }
 0x102   :  { %v479_v60 = vsel %vm337_vm2, %v469_v55, 0.0  ;;  %v471_v61 = vmul.f32 %v443_v56, %v2345_v13  ;;  %v473_v5 = vmul.f32 %v451_v62, %v2354_v16  ;;  %v459_v6 = vrot.slane %v427_v63, %v2398_v44  ;;  %v361_v47 = vpop.xlane.xlu0 %360 }
 0x103   :  { %357 = vadd.xlane.f32.xlu1 %v356_v54  ;;  %480 = vadd.xlane.f32.xlu0 %v479_v60  ;;  %v482_v9 = vsel %vm337_vm2, %v470_v4, 0.0  ;;  %v488_v17 = vsel %vm337_vm2, %v472_v8, 0.0  ;;  %v474_v19 = vmul.f32 %v455_v15, %v2392_v39  ;;  %2061 = vlog2.f32 %v187_v36 }
 0x104   :  { %v485_v3 = vsel %vm337_vm2, %v471_v61, 0.0  ;;  %v491_v11 = vsel %vm337_vm2, %v473_v5, 0.0  ;;  %v475_v14 = vmul.f32 %v459_v6, %v2365_v22  ;;  %2063 = vrsqrt.f32 %v362_v37 }
 0x105   :  { %v494_v20 = vsel %vm337_vm2, %v474_v19, 0.0  ;;  %2065 = vrsqrt.f32 %v363_v40  ;;  %v190_v49 = vmul.f32 -0.5, %v2060_v34  ;;  %v365_v51 = vmax.f32 %v349_v38, 1e-16 }
 0x106   :  { %v497_v18 = vsel %vm337_vm2, %v475_v14, 0.0  ;;  %v193_v54 = vand.u32 2147483647, %v2060_v34  ;;  %v2437_v56 = vsub.s32 1, %v2376_v31  ;;  %v367_v62 = vmax.f32 %v355_v43, 1e-16 }
 0x107   :  { %477 = vadd.xlane.f32.xlu1 %v476_v0  ;;  %486 = vadd.xlane.f32.xlu0 %v485_v3  ;;  %v191_v53 = vadd.f32 1.0, %v190_v49  ;;  %v159_v8 = vmax.f32 %v2372_v26, 0.0  ;;  %v2456_v19 = vsub.s32 3, %v2376_v31  ;;  %v2477_v40 = vsub.s32 4, %v2376_v31 }
 0x108   :  { %vm194_vm3 = vcmp.lt.f32.partialorder %v193_v54, 0.0004427343 }
 0x109   :  { %v192_v63 = vmul.f32 %v2060_v34, %v191_v53  ;;  %v2493_v53 = vsub.s32 6, %v2376_v31 }
 0x10b   :  { %483 = vadd.xlane.f32.xlu1 %v482_v9  ;;  %492 = vadd.xlane.f32.xlu0 %v491_v11  ;;  %v2451_v11 = vsub.s32 2, %v2376_v31 }
 0x10f   :  { %489 = vadd.xlane.f32.xlu1 %v488_v17  ;;  %498 = vadd.xlane.f32.xlu0 %v497_v18  ;;  %v369_v18 = vmax.f32 %v361_v47, 1e-16 }
 0x110   :  { %v2062_v50 = vpop.eup %2061 }
 0x111   :  { %v2434_v55 = vpop.eup %2063  ;;  %v189_v60 = vmul.f32 0.6931472, %v2062_v50 }
 0x112   :  { %v2439_v57 = vpop.eup %2065 }
 0x113   :  { %495 = vadd.xlane.f32.xlu1 %v494_v20  ;;  %v195_v4 = vsel %vm194_vm3, %v192_v63, %v189_v60  ;;  %vm3095_vm3 = vcmask 72704  }
 0x114   :  { %v223_v14 = vadd.f32 %v195_v4, %v159_v8  ;;  %v260_v4 = vsel %vm3097_vm5, %v2372_v26, -inf }
 0x116   :  { %v2465_v27 = vsel %vm163_vm4, %v2372_v26, %v223_v14  ;;  %v601_v14 = vand.u32 127, %v383_v29 }
 0x184   :  { %v503_v41 = vpop.xlane.xlu1 %502 }
 0x185   :  { %v504_v42 = vmax.f32 %v503_v41, 1e-16 }
 0x187   :  { %2067 = vrsqrt.f32 %v504_v42  ;;  %v2480_v42 = vsub.s32 5, %v2376_v31 }
 0x188   :  { %v352_v45 = vpop.xlane.xlu1 %351  ;;  %2069 = vrsqrt.f32 %v364_v46 }
 0x189   :  { %v366_v52 = vmax.f32 %v352_v45, 1e-16  ;;  %2071 = vrsqrt.f32 %v365_v51 }
 0x18b   :  { %2073 = vrsqrt.f32 %v366_v52 }
 0x18c   :  { %v358_v48 = vpop.xlane.xlu1 %357  ;;  %v481_v58 = vpop.xlane.xlu0 %480  ;;  %2075 = vrsqrt.f32 %v367_v62  ;;  %v2499_v62 = vsub.s32 7, %v2376_v31 }
 0x18d   :  { %v507_v1 = vmul.f32 %v2439_v57, %v481_v58  ;;  %v368_v9 = vmax.f32 %v358_v48, 1e-16 }
 0x18f   :  { %2077 = vrsqrt.f32 %v368_v9 }
 0x190   :  { %v478_v59 = vpop.xlane.xlu1 %477  ;;  %v487_v30 = vpop.xlane.xlu0 %486  ;;  %2079 = vrsqrt.f32 %v369_v18  ;;  %v2510_v18 = vsub.s32 %v601_v14, %v2376_v31 }
 0x191   :  { %v506_v3 = vmul.f32 %v2434_v55, %v478_v59 }
 0x194   :  { %v2441_v61 = vpop.eup %2067  ;;  %v484_v15 = vpop.xlane.xlu1 %483 }
 0x195   :  { %v522_v0 = vrot.slane %v2441_v61, %v2437_v56  ;;  %v518_v2 = vrot.slane %v2441_v61, %v2398_v44  ;;  %v2453_v17 = vpop.eup %2069  ;;  %v526_v20 = vrot.slane %v2441_v61, %v2451_v11  ;;  %v530_v35 = vrot.slane %v2441_v61, %v2456_v19  ;;  %v493_v46 = vpop.xlane.xlu0 %492 }
 0x196   :  { %v508_v23 = vmul.f32 %v2453_v17, %v484_v15  ;;  %v2468_v28 = vpop.eup %2071  ;;  %v534_v47 = vrot.slane %v2441_v61, %v2477_v40  ;;  %v538_v48 = vrot.slane %v2441_v61, %v2480_v42  ;;  %v542_v63 = vrot.slane %v2441_v61, %v2493_v53 }
 0x197   :  { %v556_v5 = vmul.f32 %v522_v0, %v507_v1  ;;  %v555_v6 = vmul.f32 %v518_v2, %v506_v3  ;;  %v509_v38 = vmul.f32 %v2468_v28, %v487_v30  ;;  %v546_v2 = vrot.slane %v2441_v61, %v2499_v62 }
 0x198   :  { %v2470_v34 = vpop.eup %2073  ;;  %v557_v36 = vmul.f32 %v526_v20, %v508_v23  ;;  %v490_v37 = vpop.xlane.xlu1 %489 }
 0x199   :  { %577 = vperm.xlu1 %2024, %v555_v6   ;;  %580 = vperm.xlu0 %2025, %v556_v5   ;;  %v558_v41 = vmul.f32 %v530_v35, %v509_v38  ;;  %v510_v43 = vmul.f32 %v2470_v34, %v490_v37  ;;  %v2483_v45 = vpop.eup %2075  ;;  %v499_v60 = vpop.xlane.xlu0 %498 }
 0x19a   :  { %v511_v49 = vmul.f32 %v2483_v45, %v493_v46 }
 0x19b   :  { %v559_v50 = vmul.f32 %v534_v47, %v510_v43 }
 0x19c   :  { %v2490_v51 = vpop.eup %2077  ;;  %v496_v52 = vpop.xlane.xlu1 %495  ;;  %v560_v54 = vmul.f32 %v538_v48, %v511_v49 }
 0x19d   :  { %2026 = vset.pattern.permute.xlu1 %v2257_v24  ;;  %v512_v58 = vmul.f32 %v2490_v51, %v496_v52  ;;  %v2496_v59 = vpop.eup %2079 }
 0x19e   :  { %565 = vperm.xlu1 %2026, %v2465_v27   ;;  %v513_v0 = vmul.f32 %v2496_v59, %v499_v60 }
 0x19f   :  { %v561_v1 = vmul.f32 %v542_v63, %v512_v58 }
 0x1a0   :  { %v562_v3 = vmul.f32 %v546_v2, %v513_v0  ;;  %v2258_v2 = vmov 17  }
 0x1a2   :  { %2027 = vset.pattern.permute.xlu1 %v2256_v21 }
 0x1a3   :  { %583 = vperm.xlu1 %2027, %v557_v36  }
 0x1a7   :  { %586 = vperm.xlu1 %2027, %v558_v41  }
 0x1ab   :  { %589 = vperm.xlu1 %2027, %v559_v50  }
 0x1af   :  { %592 = vperm.xlu1 %2027, %v560_v54  }
 0x1b3   :  { %595 = vperm.xlu1 %2027, %v561_v1  }
 0x1b7   :  { %598 = vperm.xlu1 %2027, %v562_v3  }
 0x1bb   :  { %2028 = vset.pattern.permute.xlu1 %v2258_v2 }
 0x1db   :  { %261 = vmax.xlane.f32.xlu1 %v260_v4 }
 0x214   :  { %v578_v5 = vpop.permute.xlu1 %577  ;;  %v581_v20 = vpop.permute.xlu0 %580 }
 0x215   :  { %v605_v23 = vrot.slane %v578_v5, %v2510_v18  ;;  %v609_v30 = vrot.slane %v581_v20, %v2510_v18 }
 0x217   :  { %v635_v38 = vsel %vm3094_vm6, %v609_v30, %v605_v23 }
 0x219   :  { %v566_v6 = vpop.permute.xlu1 %565 }
 0x21e   :  { %v584_v8 = vpop.permute.xlu1 %583 }
 0x21f   :  { %v613_v35 = vrot.slane %v584_v8, %v2510_v18 }
 0x221   :  { %v637_v41 = vsel %vm3093_vm7, %v613_v35, %v635_v38 }
 0x222   :  { %v587_v9 = vpop.permute.xlu1 %586 }
 0x223   :  { %v617_v36 = vrot.slane %v587_v9, %v2510_v18 }
 0x225   :  { %v639_v46 = vsel %vm3092_vm8, %v617_v36, %v637_v41 }
 0x226   :  { %v590_v15 = vpop.permute.xlu1 %589 }
 0x227   :  { %v621_v37 = vrot.slane %v590_v15, %v2510_v18 }
 0x229   :  { %v641_v47 = vsel %vm3091_vm9, %v621_v37, %v639_v46 }
 0x22a   :  { %v593_v61 = vpop.permute.xlu1 %592 }
 0x22b   :  { %v625_v31 = vrot.slane %v593_v61, %v2510_v18 }
 0x22d   :  { %v643_v49 = vsel %vm3090_vm10, %v625_v31, %v641_v47 }
 0x22e   :  { %v596_v29 = vpop.permute.xlu1 %595 }
 0x22f   :  { %v629_v43 = vrot.slane %v596_v29, %v2510_v18 }
 0x231   :  { %v645_v52 = vsel %vm3089_vm11, %v629_v43, %v643_v49 }
 0x232   :  { %v599_v48 = vpop.permute.xlu1 %598 }
 0x233   :  { %v633_v50 = vrot.slane %v599_v48, %v2510_v18 }
 0x235   :  { %v647_v54 = vsel %vm3088_vm12, %v633_v50, %v645_v52 }
 0x236   :  { %v649_v58 = vmul.f32 %v647_v54, %v566_v6 }
 0x238   :  { %v651_v60 = vsel %vm3099_vm13, %v649_v58, -inf }
 0x239   :  { %652 = vmax.xlane.f32.xlu0 %v651_v60 }
 0x264   :  { %v262_v63 = vpop.xlane.xlu1 %261 }
 0x265   :  { %v272_v0 = vsub.f32 %v2372_v26, %v262_v63 }
 0x267   :  { %v276_v1 = vmul.f32 1.442695, %v272_v0 }
 0x269   :  { %2081 = vpow2.f32 %v276_v1 }
 0x26a   :  { %2083 = vtanh.f32 %v2370_v25 }
 0x276   :  { %v2531_v3 = vpop.eup %2081 }
 0x277   :  { %288 = vrot.lane.b32.xlu0 %v2531_v3, %s2259_s26  ;;  %v2084_v4 = vpop.eup %2083 }
 0x278   :  { %v670_v5 = vrot.slane %v2084_v4, %v2384_v33  ;;  %v663_v20 = vcombine.high %v2084_v4, %v2084_v4 }
 0x27a   :  { %v686_v6 = vrot.slane %v670_v5, %v2384_v33  ;;  %v678_v8 = vcombine.high %v670_v5, %v670_v5  ;;  %v677_v35 = vrot.slane %v663_v20, %v2384_v33 }
 0x27c   :  { %v715_v9 = vrot.slane %v686_v6, %v2398_v44  ;;  %v708_v14 = vcombine.high %v686_v6, %v686_v6  ;;  %v700_v15 = vrot.slane %v678_v8, %v2384_v33  ;;  %v693_v38 = vrot.slane %v677_v35, %v2384_v33 }
 0x27d   :  { %v679_v31 = vcombine.high %v677_v35, %v677_v35  ;;  %v1757_v6 = vmul.f32 -1.442695, %v2372_v26  ;;  %v2260_v35 = vmov 20  }
 0x27e   :  { %v752_v61 = vmul.f32 %v715_v9, %v2325_v7  ;;  %v723_v23 = vrot.slane %v708_v14, %v2398_v44  ;;  %v710_v30 = vcombine.high %v700_v15, %v700_v15  ;;  %v731_v46 = vrot.slane %v693_v38, %v2398_v44  ;;  %2030 = vset.pattern.permute.xlu0 %v2260_v35 }
 0x27f   :  { %v707_v47 = vrot.slane %v679_v31, %v2384_v33  ;;  %2085 = vpow2.f32 %v1757_v6  ;;  %v784_v14 = vmul.f32 %v2084_v4, %v2084_v4  ;;  %v2261_v4 = vmov 19  }
 0x280   :  { %v760_v36 = vsel %vm337_vm2, %v752_v61, 0.0  ;;  %v754_v37 = vmul.f32 %v723_v23, %v2340_v12  ;;  %v727_v29 = vrot.slane %v710_v30, %v2398_v44  ;;  %v756_v49 = vmul.f32 %v731_v46, %v2381_v32 }
 0x281   :  { %v735_v50 = vrot.slane %v707_v47, %v2398_v44  ;;  %v711_v52 = vcombine.high %v707_v47, %v707_v47  ;;  %v172_v47 = vand.u32 2147483647, %v2370_v25 }
 0x282   :  { %v766_v41 = vsel %vm337_vm2, %v754_v37, 0.0  ;;  %v755_v43 = vmul.f32 %v727_v29, %v2345_v13  ;;  %v772_v54 = vsel %vm337_vm2, %v756_v49, 0.0  ;;  %v709_v37 = vcombine.high %v693_v38, %v693_v38  ;;  %v47_v49 = vld [vmem:[#allocation2 + $0x18] sm:$0xff] }
 0x283   :  { %v757_v60 = vmul.f32 %v735_v50, %v2354_v16  ;;  %v743_v63 = vrot.slane %v711_v52, %v2398_v44 }
 0x284   :  { %v769_v48 = vsel %vm337_vm2, %v755_v43, 0.0  ;;  %v739_v31 = vrot.slane %v709_v37, %v2398_v44 }
 0x285   :  { %v775_v13 = vsel %vm337_vm2, %v757_v60, 0.0  ;;  %v759_v0 = vmul.f32 %v743_v63, %v2365_v22  ;;  %v785_v22 = vsel %vm337_vm2, %v784_v14, 0.0 }
 0x286   :  { %v758_v43 = vmul.f32 %v739_v31, %v2392_v39  ;;  %v160_v31 = vmax.f32 %v2370_v25, 0.0 }
 0x287   :  { %v781_v1 = vsel %vm337_vm2, %v759_v0, 0.0 }
 0x288   :  { %v778_v46 = vsel %vm337_vm2, %v758_v43, 0.0 }
 0x28c   :  { %v2086_v20 = vpop.eup %2085 }
 0x28d   :  { %v243_v61 = vadd.f32 1.0, %v2086_v20 }
 0x296   :  { %761 = vadd.xlane.f32.xlu0 %v760_v36  ;;  %v719_v36 = vrot.slane %v700_v15, %v2398_v44  ;;  %v176_v15 = vsub.f32 0.0, %v172_v47  ;;  %v255_v47 = vadd.f32 1.0, %v2465_v27 }
 0x298   :  { %v753_v29 = vmul.f32 %v719_v36, %v2333_v10  ;;  %v181_v38 = vmul.f32 1.442695, %v176_v15 }
 0x29a   :  { %767 = vadd.xlane.f32.xlu0 %v766_v41  ;;  %v763_v41 = vsel %vm337_vm2, %v753_v29, 0.0 }
 0x29e   :  { %770 = vadd.xlane.f32.xlu0 %v769_v48  ;;  %v46_v48 = vld [vmem:[#allocation2 + $0x10] sm:$0xff] }
 0x29f   :  { %1783 = vmatprep.mubr.msk.f32.mxu1 %vm53_vm1, %v46_v48  ;;  %v2263_v48 = vmov 21  }
 0x2a0   :  { %1784 = vmatmul.mubr.msk.f32.vlgmr.msra.gmra.mxu1 %vm53_vm1, %v47_v49  ;;  %vm3096_vm1 = vcmask 7168  }
 0x2a2   :  { %773 = vadd.xlane.f32.xlu0 %v772_v54 }
 0x2a6   :  { %776 = vadd.xlane.f32.xlu0 %v775_v13 }
 0x2aa   :  { %782 = vadd.xlane.f32.xlu0 %v781_v1 }
 0x2c2   :  { %v653_v32 = vpop.xlane.xlu0 %652 }
 0x2c3   :  { %v654_v5 = vsub.f32 %v649_v58, %v653_v32 }
 0x2c5   :  { %v655_v8 = vmul.f32 1.442695, %v654_v5 }
 0x2c7   :  { %2087 = vpow2.f32 %v655_v8 }
 0x2c8   :  { %2089 = vrcp.f32 %v243_v61 }
 0x2c9   :  { %2091 = vpow2.f32 %v181_v38 }
 0x2d4   :  { %v2562_v23 = vpop.eup %2087 }
 0x2d5   :  { %v657_v58 = vsel %vm3099_vm13, %v2562_v23, 0.0  ;;  %v2090_v26 = vpop.eup %2089 }
 0x2d6   :  { %v1485_v30 = vsub.f32 1.0, %v2090_v26  ;;  %v2092_v52 = vpop.eup %2091 }
 0x2d7   :  { %v196_v54 = vadd.f32 1.0, %v2092_v52  ;;  %v199_v32 = vmul.f32 -0.5, %v2092_v52 }
 0x2e9   :  { %v289_v16 = vpop.permute.xlu0 %288 }
 0x2ea   :  { %v301_v9 = vsel %vm3098_vm14, %v289_v16, 0.0  ;;  %v200_v16 = vadd.f32 1.0, %v199_v32 }
 0x2eb   :  { %302 = vadd.xlane.f32.xlu1 %v301_v9  ;;  %v202_v9 = vand.u32 2147483647, %v2092_v52 }
 0x2ed   :  { %vm203_vm15 = vcmp.lt.f32.partialorder %v202_v9, 0.0004427343  ;;  %v1484_v9 = vld [vmem:[#allocation5] sm:$0xff] }
 0x2ef   :  { %786 = vadd.xlane.f32.xlu1 %v785_v22 }
 0x2f3   :  { %658 = vadd.xlane.f32.xlu1 %v657_v58  ;;  %v201_v58 = vmul.f32 %v2092_v52, %v200_v16 }
 0x304   :  { %1488 = vperm.xlu1 %2028, %v1485_v30  }
 0x308   :  { %2029 = vset.pattern.permute.xlu1 %v2261_v4 }
 0x31f   :  { %v762_v50 = vpop.xlane.xlu0 %761 }
 0x320   :  { %v790_v61 = vmul.f32 %v2434_v55, %v762_v50 }
 0x323   :  { %v768_v60 = vpop.xlane.xlu0 %767 }
 0x324   :  { %v792_v27 = vmul.f32 %v2453_v17, %v768_v60 }
 0x327   :  { %v771_v0 = vpop.xlane.xlu0 %770 }
 0x328   :  { %764 = vadd.xlane.f32.xlu1 %v763_v41  ;;  %v793_v32 = vmul.f32 %v2468_v28, %v771_v0 }
 0x32b   :  { %v774_v1 = vpop.xlane.xlu0 %773 }
 0x32c   :  { %779 = vadd.xlane.f32.xlu1 %v778_v46  ;;  %v2262_v46 = vmov 18   ;;  %v794_v16 = vmul.f32 %v2470_v34, %v774_v1 }
 0x32f   :  { %v777_v14 = vpop.xlane.xlu0 %776 }
 0x330   :  { %v795_v26 = vmul.f32 %v2483_v45, %v777_v14 }
 0x374   :  { %v303_v39 = vpop.xlane.xlu1 %302 }
 0x375   :  { %2093 = vrcp.f32 %v303_v39 }
 0x376   :  { %2095 = vlog2.f32 %v196_v54 }
 0x378   :  { %v787_v63 = vpop.xlane.xlu1 %786 }
 0x379   :  { %v788_v13 = vmax.f32 %v787_v63, 1e-16 }
 0x37b   :  { %2097 = vrsqrt.f32 %v788_v13 }
 0x37c   :  { %v659_v49 = vpop.xlane.xlu1 %658 }
 0x37d   :  { %2099 = vrcp.f32 %v659_v49 }
 0x380   :  { %v1489_v15 = vpop.permute.xlu1 %1488 }
 0x382   :  { %v2094_v5 = vpop.eup %2093 }
 0x383   :  { %v2096_v6 = vpop.eup %2095  ;;  %v317_v8 = vmul.f32 %v2094_v5, %v2531_v3 }
 0x384   :  { %v198_v20 = vmul.f32 0.6931472, %v2096_v6 }
 0x385   :  { %1525 = vperm.xlu0 %2030, %v317_v8   ;;  %1515 = vperm.xlu1 %2029, %v317_v8  }
 0x386   :  { %v204_v36 = vsel %vm203_vm15, %v201_v58, %v198_v20  ;;  %v1491_v20 = vmul.f32 %v1489_v15, %v1484_v9 }
 0x387   :  { %v224_v41 = vadd.f32 %v204_v36, %v160_v31 }
 0x388   :  { %v2578_v22 = vpop.eup %2097 }
 0x389   :  { %2032 = vset.pattern.permute.xlu0 %v2256_v21  ;;  %2031 = vset.pattern.permute.xlu1 %v2256_v21  ;;  %v802_v3 = vrot.slane %v2578_v22, %v2398_v44  ;;  %v822_v30 = vrot.slane %v2578_v22, %v2480_v42  ;;  %v2593_v43 = vsel %vm164_vm0, %v2370_v25, %v224_v41 }
 0x38a   :  { %v806_v50 = vrot.slane %v2578_v22, %v2437_v56  ;;  %v810_v39 = vrot.slane %v2578_v22, %v2451_v11  ;;  %v814_v13 = vrot.slane %v2578_v22, %v2456_v19  ;;  %v818_v6 = vrot.slane %v2578_v22, %v2477_v40 }
 0x38b   :  { %v839_v37 = vmul.f32 %v802_v3, %v790_v61  ;;  %v844_v29 = vmul.f32 %v822_v30, %v795_v26  ;;  %v826_v1 = vrot.slane %v2578_v22, %v2493_v53  ;;  %v830_v3 = vrot.slane %v2578_v22, %v2499_v62 }
 0x38c   :  { %v841_v63 = vmul.f32 %v810_v39, %v792_v27  ;;  %v842_v5 = vmul.f32 %v814_v13, %v793_v32  ;;  %v843_v60 = vmul.f32 %v818_v6, %v794_v16 }
 0x38d   :  { %861 = vperm.xlu1 %2031, %v839_v37   ;;  %876 = vperm.xlu0 %2032, %v844_v29   ;;  %v263_v37 = vsel %vm3097_vm5, %v2370_v25, -inf }
 0x391   :  { %2033 = vset.pattern.permute.xlu0 %v2257_v24 }
 0x392   :  { %849 = vperm.xlu0 %2033, %v2593_v43  }
 0x396   :  { %2034 = vset.pattern.permute.xlu0 %v2262_v46 }
 0x397   :  { %1509 = vperm.xlu0 %2034, %v317_v8   ;;  %v2100_v8 = vpop.eup %2099 }
 0x398   :  { %v661_v14 = vmul.f32 %v2100_v8, %v2562_v23  ;;  %v783_v23 = vpop.xlane.xlu0 %782 }
 0x399   :  { %v797_v30 = vmul.f32 %v2496_v59, %v783_v23 }
 0x39a   :  { %v1492_v61 = vadd.f32 %v1491_v20, %v661_v14 }
 0x39b   :  { %2035 = vset.pattern.permute.xlu0 %v2263_v48  ;;  %v846_v36 = vmul.f32 %v830_v3, %v797_v30 }
 0x39c   :  { %1537 = vperm.xlu0 %2035, %v255_v47  }
 0x3a0   :  { %2036 = vset.pattern.permute.xlu0 %v2258_v2 }
 0x3b1   :  { %v765_v38 = vpop.xlane.xlu1 %764 }
 0x3b2   :  { %v791_v52 = vmul.f32 %v2439_v57, %v765_v38 }
 0x3b4   :  { %v840_v54 = vmul.f32 %v806_v50, %v791_v52 }
 0x3b5   :  { %v780_v0 = vpop.xlane.xlu1 %779 }
 0x3b6   :  { %864 = vperm.xlu1 %2031, %v840_v54   ;;  %v796_v58 = vmul.f32 %v2490_v51, %v780_v0 }
 0x3b8   :  { %v845_v26 = vmul.f32 %v826_v1, %v796_v58 }
 0x3ba   :  { %867 = vperm.xlu1 %2031, %v841_v63  }
 0x3be   :  { %870 = vperm.xlu1 %2031, %v842_v5  }
 0x3c2   :  { %873 = vperm.xlu1 %2031, %v843_v60  }
 0x3c6   :  { %1494 = vrot.lane.b32.xlu1 %v1492_v61, %s2264_s0 }
 0x3ca   :  { %1497 = vrot.lane.b32.xlu1 %v1492_v61, %s2265_s27 }
 0x3ce   :  { %1500 = vrot.lane.b32.xlu1 %v1492_v61, %s2266_s28 }
 0x3d2   :  { %879 = vperm.xlu1 %2031, %v845_v26  }
 0x3d6   :  { %882 = vperm.xlu1 %2031, %v846_v36  }
 0x3da   :  { %2037 = vset.pattern.permute.xlu1 %v2261_v4 }
 0x3fa   :  { %264 = vmax.xlane.f32.xlu1 %v263_v37 }
 0x400   :  { %v1516_v29 = vpop.permute.xlu1 %1515  ;;  %v1526_v27 = vpop.permute.xlu0 %1525 }
 0x408   :  { %v862_v31 = vpop.permute.xlu1 %861  ;;  %v877_v14 = vpop.permute.xlu0 %876 }
 0x409   :  { %v887_v6 = vrot.slane %v862_v31, %v2510_v18  ;;  %v907_v1 = vrot.slane %v877_v14, %v2510_v18 }
 0x40d   :  { %v850_v36 = vpop.permute.xlu0 %849 }
 0x431   :  { %v865_v41 = vpop.permute.xlu1 %864 }
 0x432   :  { %v891_v32 = vrot.slane %v865_v41, %v2510_v18 }
 0x434   :  { %v916_v9 = vsel %vm3094_vm6, %v891_v32, %v887_v6  ;;  %v1510_v6 = vpop.permute.xlu0 %1509 }
 0x435   :  { %v868_v47 = vpop.permute.xlu1 %867 }
 0x436   :  { %v895_v5 = vrot.slane %v868_v47, %v2510_v18 }
 0x438   :  { %v917_v60 = vsel %vm3093_vm7, %v895_v5, %v916_v9  ;;  %v2673_v14 = vpop.permute.xlu0 %1537 }
 0x439   :  { %v871_v49 = vpop.permute.xlu1 %870 }
 0x43a   :  { %v899_v8 = vrot.slane %v871_v49, %v2510_v18  ;;  %v2649_v49 = vpop.f32.mrf.mxu1 }
 0x43c   :  { %v918_v61 = vsel %vm3092_vm8, %v899_v8, %v917_v60  ;;  %vm1804_vm8 = vcmp.lt.f32.partialorder %v2673_v14, 0 }
 0x43d   :  { %v874_v15 = vpop.permute.xlu1 %873 }
 0x43e   :  { %v903_v16 = vrot.slane %v874_v15, %v2510_v18  ;;  %v2651_v15 = vpop.f32.mrf.mxu1 }
 0x440   :  { %v919_v0 = vsel %vm3091_vm9, %v903_v16, %v918_v61 }
 0x441   :  { %v1495_v38 = vpop.permute.xlu1 %1494  ;;  %v920_v26 = vsel %vm3090_vm10, %v907_v1, %v919_v0 }
 0x445   :  { %v1498_v50 = vpop.permute.xlu1 %1497 }
 0x446   :  { %v1504_v22 = vsel %vm3096_vm1, %v1495_v38, %v1498_v50 }
 0x449   :  { %v1501_v52 = vpop.permute.xlu1 %1500 }
 0x44a   :  { %v1506_v54 = vsel %vm3095_vm3, %v1504_v22, %v1501_v52 }
 0x44b   :  { %v1518_v39 = vmul.f32 %v1516_v29, %v1506_v54  ;;  %v1528_v63 = vmul.f32 %v1526_v27, %v1506_v54  ;;  %v1512_v0 = vmul.f32 %v1510_v6, %v1506_v54 }
 0x44d   :  { %1520 = vrot.lane.b32.xlu0 %v1518_v39, %s2267_s29  ;;  %v880_v13 = vpop.permute.xlu1 %879 }
 0x44e   :  { %v911_v58 = vrot.slane %v880_v13, %v2510_v18 }
 0x450   :  { %v921_v3 = vsel %vm3089_vm11, %v911_v58, %v920_v26 }
 0x451   :  { %1530 = vrot.lane.b32.xlu0 %v1528_v63, %s2268_s30  ;;  %v883_v20 = vpop.permute.xlu1 %882 }
 0x452   :  { %v915_v23 = vrot.slane %v883_v20, %v2510_v18 }
 0x454   :  { %v922_v30 = vsel %vm3088_vm12, %v915_v23, %v921_v3  ;;  %v1800_v3 = vand.u32 2147483647, %v2673_v14 }
 0x455   :  { %v2644_v37 = vmul.f32 %v922_v30, %v850_v36  ;;  %v1805_v36 = vtrunc.f32 %v2673_v14 }
 0x456   :  { %v1809_v30 = vtrunc.f32 %v1800_v3  ;;  %vm1801_vm4 = vcmp.eq.f32.partialorder %v1800_v3, 2139095040  ;;  %vm1808_vm6 = vcmp.lt.f32.partialorder %v1800_v3, 1266679808 }
 0x457   :  { %v925_v29 = vsel %vm3099_vm13, %v2644_v37, -inf  ;;  %vm1806_vm15 = vcmp.ne.f32.partialorder %v2673_v14, %v1805_v36 }
 0x458   :  { %vm2686_vm0 = vmor %vm1806_vm15, %vm1801_vm4 }
 0x459   :  { %vm1813_vm11 = vmneg %vm2686_vm0 }
 0x470   :  { %926 = vmax.xlane.f32.xlu0 %v925_v29 }
 0x483   :  { %v265_v31 = vpop.xlane.xlu1 %264 }
 0x484   :  { %v273_v41 = vsub.f32 %v2370_v25, %v265_v31 }
 0x486   :  { %v278_v47 = vmul.f32 1.442695, %v273_v41 }
 0x488   :  { %2101 = vpow2.f32 %v278_v47 }
 0x489   :  { %2103 = vtanh.f32 %v2651_v15 }
 0x495   :  { %v2653_v38 = vpop.eup %2101 }
 0x496   :  { %290 = vrot.lane.b32.xlu1 %v2653_v38, %s2259_s26  ;;  %v2658_v50 = vpop.eup %2103 }
 0x497   :  { %v944_v22 = vrot.slane %v2658_v50, %v2384_v33 }
 0x499   :  { %v960_v52 = vrot.slane %v944_v22, %v2384_v33  ;;  %v952_v39 = vcombine.high %v944_v22, %v944_v22  ;;  %v937_v22 = vcombine.high %v2658_v50, %v2658_v50 }
 0x49b   :  { %v989_v27 = vrot.slane %v960_v52, %v2398_v44  ;;  %v2665_v63 = vrot.slane %v952_v39, %v2384_v33  ;;  %v982_v5 = vcombine.high %v960_v52, %v960_v52  ;;  %v2269_v39 = vmov 2139095040  }
 0x49d   :  { %v1026_v13 = vmul.f32 %v989_v27, %v2325_v7  ;;  %v993_v32 = vrot.slane %v2665_v63, %v2398_v44  ;;  %v997_v9 = vrot.slane %v982_v5, %v2398_v44  ;;  %v1836_v27 = vsel %vm1804_vm8, 0, %v2269_v39 }
 0x49e   :  { %v951_v5 = vrot.slane %v937_v22, %v2384_v33  ;;  %v2761_v22 = vld [vmem:[%s3085_s2 + $0x20] sm:$0xff] }
 0x49f   :  { %v1034_v8 = vsel %vm337_vm2, %v1026_v13, 0.0  ;;  %v1027_v16 = vmul.f32 %v993_v32, %v2333_v10  ;;  %v1028_v20 = vmul.f32 %v997_v9, %v2340_v12  ;;  %v1810_v12 = vcvt.f32.s32 %v1809_v30 }
 0x4a0   :  { %v984_v32 = vcombine.high %v2665_v63, %v2665_v63 }
 0x4a1   :  { %v1037_v60 = vsel %vm337_vm2, %v1027_v16, 0.0  ;;  %v1040_v61 = vsel %vm337_vm2, %v1028_v20, 0.0  ;;  %v1811_v54 = vand.u32 1, %v1810_v12  ;;  %v1837_v16 = vxor.u32 2147483648, %v1836_v27 }
 0x4a2   :  { %v1001_v63 = vrot.slane %v984_v32, %v2398_v44 }
 0x4a3   :  { %vm1812_vm12 = vcmp.eq.s32.totalorder %v1811_v54, 1 }
 0x4a4   :  { %vm1814_vm9 = vmand %vm1812_vm12, %vm1813_vm11 }
 0x4a5   :  { %vm2702_vm15 = vmand %vm1808_vm6, %vm1814_vm9 }
 0x4ba   :  { %1035 = vadd.xlane.f32.xlu1 %v1034_v8  ;;  %v1824_v8 = vsel %vm1804_vm8, 2139095040, %v2256_v21 }
 0x4be   :  { %1038 = vadd.xlane.f32.xlu1 %v1037_v60 }
 0x4bf   :  { %v1521_v7 = vpop.permute.xlu0 %1520 }
 0x4c0   :  { %v1523_v58 = vadd.f32 %v1521_v7, %v1512_v0  ;;  %v1838_v7 = vsel %vm2702_vm15, %v1837_v16, %v1836_v27 }
 0x4c2   :  { %1041 = vadd.xlane.f32.xlu1 %v1040_v61  ;;  %v967_v61 = vrot.slane %v951_v5, %v2384_v33 }
 0x4c3   :  { %v1531_v1 = vpop.permute.xlu0 %1530 }
 0x4c4   :  { %v1533_v23 = vadd.f32 %v1531_v1, %v1523_v58  ;;  %v953_v1 = vcombine.high %v951_v5, %v951_v5 }
 0x4c6   :  { %v2678_v26 = vmax.f32 %v1533_v23, 1e-06  ;;  %v981_v54 = vrot.slane %v953_v1, %v2384_v33 }
 0x4c8   :  { %v1796_v10 = vand.u32 2147483647, %v2678_v26  ;;  %vm1817_vm7 = vcmp.eq.f32.partialorder %v2678_v26, 0  ;;  %vm1816_vm11 = vcmp.lt.f32.partialorder %v2678_v26, 0  ;;  %vm1819_vm9 = vcmp.lt.s32.totalorder %v2678_v26, 0 }
 0x4c9   :  { %vm1829_vm12 = vmand %vm1804_vm8, %vm1817_vm7  ;;  %v1839_v30 = vsel %vm1816_vm11, %v1838_v7, %v1836_v27  ;;  %v1009_v27 = vrot.slane %v981_v54, %v2398_v44 }
 0x4ca   :  { %2105 = vlog2.f32 %v1796_v10  ;;  %vm1820_vm10 = vcmp.gt.f32.partialorder %v1796_v10, 1065353216  ;;  %vm1822_vm6 = vmand %vm1816_vm11, %vm2686_vm0  ;;  %vm1833_vm0 = vcmp.eq.f32.partialorder %v2678_v26, 3212836864  ;;  %vm3106_vm11 = vcmask 7168  }
 0x4cb   :  { %vm2696_vm3 = vmxor %vm1804_vm8, %vm1820_vm10  ;;  %vm1821_vm8 = vcmp.eq.f32.partialorder %v1796_v10, 2139095040  ;;  %v2750_v10 = vld [vmem:[%s3085_s2 + $0x18] sm:$0xff] }
 0x4cc   :  { %vm1831_vm10 = vmor %vm1829_vm12, %vm2696_vm3  ;;  %vm1841_vm12 = vcmp.ne.f32.partialorder %v2678_v26, %v2678_v26  ;;  %v1029_v3 = vmul.f32 %v2750_v10, %v1001_v63  ;;  %v1758_v63 = vmul.f32 -1.442695, %v2370_v25 }
 0x4cd   :  { %v1832_v60 = vsel %vm1831_vm10, 2139095040, %v2256_v21  ;;  %vm1826_vm3 = vmand %vm1819_vm9, %vm2702_vm15  ;;  %vm1842_vm15 = vcmp.ne.f32.partialorder %v2673_v14, %v2673_v14  ;;  %vm1802_vm10 = vcmp.eq.f32.partialorder %v2673_v14, 0  ;;  %vm1803_vm9 = vcmp.eq.f32.partialorder %v2673_v14, 1065353216 }
 0x4ce   :  { %v1834_v58 = vsel %vm1833_vm0, 1065353216, %v1832_v60  ;;  %vm3108_vm0 = vcmask 1041409  }
 0x4d7   :  { %v2106_v29 = vpop.eup %2105 }
 0x4d8   :  { %v1798_v31 = vmul.f32 %v2106_v29, %v2673_v14  ;;  %v1043_v14 = vsel %vm337_vm2, %v1029_v3, 0.0  ;;  %v985_v3 = vcombine.high %v981_v54, %v981_v54 }
 0x4da   :  { %2107 = vpow2.f32 %v1798_v31  ;;  %v1005_v31 = vrot.slane %v967_v61, %v2398_v44 }
 0x4dc   :  { %v1030_v52 = vmul.f32 %v2761_v22, %v1005_v31  ;;  %v1017_v31 = vrot.slane %v985_v3, %v2398_v44 }
 0x4de   :  { %v1046_v32 = vsel %vm337_vm2, %v1030_v52, 0.0 }
 0x4e7   :  { %v2108_v13 = vpop.eup %2107 }
 0x4e8   :  { %v1823_v6 = vsel %vm1822_vm6, 2143289344, %v2108_v13  ;;  %vm1843_vm6 = vmor %vm1841_vm12, %vm1842_vm15  ;;  %v983_v13 = vcombine.high %v967_v61, %v967_v61  ;;  %vm3109_vm12 = vcmask 1042434   ;;  %vm3112_vm15 = vcmask 1045509  }
 0x4e9   :  { %v1825_v9 = vsel %vm1817_vm7, %v1824_v8, %v1823_v6  ;;  %vm1818_vm7 = vcmp.eq.f32.partialorder %v2678_v26, 1065353216 }
 0x4ea   :  { %v1827_v20 = vxor.u32 2147483648, %v1825_v9  ;;  %vm1845_vm1 = vmor %vm1818_vm7, %vm1802_vm10  ;;  %v1013_v6 = vrot.slane %v983_v13, %v2398_v44  ;;  %vm3110_vm7 = vcmask 1043459   ;;  %vm3113_vm10 = vcmask 1046534  }
 0x4ec   :  { %v1828_v0 = vsel %vm1826_vm3, %v1827_v20, %v1825_v9  ;;  %v2778_v20 = vld [vmem:[%s3085_s2 + $0x30] sm:$0xff]  ;;  %vm3107_vm3 = vcmask 72704  }
 0x4ed   :  { %v1835_v23 = vsel %vm1801_vm4, %v1834_v58, %v1828_v0  ;;  %v1032_v7 = vmul.f32 %v2778_v20, %v1013_v6  ;;  %vm165_vm4 = vcmp.ne.f32.partialorder %v2651_v15, %v2651_v15 }
 0x4ee   :  { %v1840_v36 = vsel %vm1821_vm8, %v1839_v30, %v1835_v23  ;;  %v1058_v23 = vmul.f32 %v2658_v50, %v2658_v50  ;;  %vm3111_vm8 = vcmask 1044484  }
 0x4ef   :  { %v1844_v12 = vsel %vm1843_vm6, 2143289344, %v1840_v36  ;;  %v1052_v61 = vsel %vm337_vm2, %v1032_v7, 0.0  ;;  %v173_v7 = vand.u32 2147483647, %v2651_v15  ;;  %vm3114_vm6 = vcmask 1047559  }
 0x4f0   :  { %v1846_v29 = vsel %vm1845_vm1, 1065353216, %v1844_v12  ;;  %v1059_v25 = vsel %vm337_vm2, %v1058_v23, 0.0 }
 0x4f1   :  { %v1847_v41 = vsel %vm1803_vm9, %v2678_v26, %v1846_v29  ;;  %v2769_v26 = vld [vmem:[%s3085_s2 + $0x28] sm:$0xff] }
 0x4f2   :  { %v1541_v47 = vsel %vm3099_vm13, %v1847_v41, 0.0  ;;  %v1031_v5 = vmul.f32 %v2769_v26, %v1009_v27 }
 0x4f3   :  { %1542 = vadd.xlane.f32.xlu1 %v1541_v47  ;;  %v2796_v47 = vld [vmem:[%s3085_s2 + $0x38] sm:$0xff] }
 0x4f4   :  { %v1049_v60 = vsel %vm337_vm2, %v1031_v5, 0.0  ;;  %v1033_v50 = vmul.f32 %v2796_v47, %v1017_v31 }
 0x4f7   :  { %1044 = vadd.xlane.f32.xlu1 %v1043_v14  ;;  %v1055_v14 = vsel %vm337_vm2, %v1033_v50, 0.0 }
 0x4f9   :  { %v927_v8 = vpop.xlane.xlu0 %926 }
 0x4fa   :  { %v928_v16 = vsub.f32 %v2644_v37, %v927_v8 }
 0x4fb   :  { %1047 = vadd.xlane.f32.xlu1 %v1046_v32 }
 0x4fc   :  { %v929_v9 = vmul.f32 1.442695, %v928_v16 }
 0x4fe   :  { %2109 = vpow2.f32 %v929_v9 }
 0x4ff   :  { %1050 = vadd.xlane.f32.xlu1 %v1049_v60  ;;  %2111 = vpow2.f32 %v1758_v63 }
 0x503   :  { %1053 = vadd.xlane.f32.xlu1 %v1052_v61  ;;  %v177_v61 = vsub.f32 0.0, %v173_v7 }
 0x508   :  { %v291_v37 = vpop.permute.xlu1 %290 }
 0x509   :  { %v304_v0 = vsel %vm3098_vm14, %v291_v37, 0.0 }
 0x50a   :  { %305 = vadd.xlane.f32.xlu0 %v304_v0  ;;  %v183_v0 = vmul.f32 1.442695, %v177_v61 }
 0x50b   :  { %v2784_v58 = vpop.eup %2109 }
 0x50c   :  { %v931_v1 = vsel %vm3099_vm13, %v2784_v58, 0.0  ;;  %v2112_v30 = vpop.eup %2111 }
 0x50d   :  { %v244_v36 = vadd.f32 1.0, %v2112_v30 }
 0x50e   :  { %932 = vadd.xlane.f32.xlu0 %v931_v1 }
 0x50f   :  { %2113 = vrcp.f32 %v244_v36 }
 0x512   :  { %1060 = vadd.xlane.f32.xlu0 %v1059_v25 }
 0x51c   :  { %v2114_v12 = vpop.eup %2113 }
 0x51d   :  { %v1548_v29 = vsub.f32 1.0, %v2114_v12 }
 0x528   :  { %1551 = vperm.xlu0 %2036, %v1548_v29  }
 0x52c   :  { %2039 = vset.pattern.permute.xlu0 %v2256_v21 }
 0x543   :  { %v1036_v52 = vpop.xlane.xlu1 %1035 }
 0x544   :  { %v1064_v23 = vmul.f32 %v2434_v55, %v1036_v52 }
 0x547   :  { %1056 = vadd.xlane.f32.xlu0 %v1055_v14  ;;  %v1039_v27 = vpop.xlane.xlu1 %1038 }
 0x548   :  { %v1065_v30 = vmul.f32 %v2439_v57, %v1039_v27 }
 0x54b   :  { %v1042_v13 = vpop.xlane.xlu1 %1041 }
 0x54c   :  { %v1066_v3 = vmul.f32 %v2453_v17, %v1042_v13 }
 0x57c   :  { %v1543_v32 = vpop.xlane.xlu1 %1542 }
 0x57d   :  { %v1544_v5 = vadd.f32 1e-06, %v1543_v32 }
 0x57f   :  { %2115 = vrcp.f32 %v1544_v5 }
 0x580   :  { %v1045_v1 = vpop.xlane.xlu1 %1044 }
 0x581   :  { %v1067_v52 = vmul.f32 %v2468_v28, %v1045_v1 }
 0x584   :  { %v1048_v31 = vpop.xlane.xlu1 %1047 }
 0x588   :  { %v1051_v13 = vpop.xlane.xlu1 %1050 }
 0x589   :  { %v1069_v7 = vmul.f32 %v2483_v45, %v1051_v13 }
 0x58c   :  { %v2116_v6 = vpop.eup %2115 }
 0x58d   :  { %v2800_v54 = vmul.f32 %v2116_v6, %v1847_v41  ;;  %v256_v6 = vadd.f32 1.0, %v2593_v43 }
 0x58f   :  { %1547 = vst.msk [vmem:[#allocation7] sm:$0xff] %vm3099_vm13, %v2800_v54 }
 0x593   :  { %v306_v8 = vpop.xlane.xlu0 %305 }
 0x594   :  { %2117 = vrcp.f32 %v306_v8  ;;  %v1068_v8 = vmul.f32 %v2470_v34, %v1048_v31 }
 0x597   :  { %v933_v16 = vpop.xlane.xlu0 %932 }
 0x59b   :  { %v1061_v9 = vpop.xlane.xlu0 %1060 }
 0x59c   :  { %v1062_v60 = vmax.f32 %v1061_v9, 1e-16 }
 0x59e   :  { %2119 = vrsqrt.f32 %v1062_v60 }
 0x59f   :  { %2121 = vpow2.f32 %v183_v0 }
 0x5a0   :  { %2123 = vrcp.f32 %v933_v16 }
 0x5a1   :  { %v2118_v63 = vpop.eup %2117 }
 0x5a2   :  { %v318_v37 = vmul.f32 %v2118_v63, %v2653_v38  ;;  %v1054_v63 = vpop.xlane.xlu1 %1053 }
 0x5a3   :  { %v1070_v0 = vmul.f32 %v2490_v51, %v1054_v63  ;;  %v1552_v1 = vpop.permute.xlu0 %1551 }
 0x5a4   :  { %1576 = vperm.xlu1 %2037, %v318_v37  }
 0x5a8   :  { %2038 = vset.pattern.permute.xlu1 %v2260_v35 }
 0x5a9   :  { %1586 = vperm.xlu1 %2038, %v318_v37  }
 0x5ab   :  { %v2807_v41 = vpop.eup %2119 }
 0x5ac   :  { %v1080_v25 = vrot.slane %v2807_v41, %v2437_v56  ;;  %v1076_v36 = vrot.slane %v2807_v41, %v2398_v44  ;;  %v1084_v29 = vrot.slane %v2807_v41, %v2451_v11  ;;  %v1088_v14 = vrot.slane %v2807_v41, %v2456_v19  ;;  %v2122_v5 = vpop.eup %2121 }
 0x5ad   :  { %2040 = vset.pattern.permute.xlu1 %v2256_v21  ;;  %v1092_v32 = vrot.slane %v2807_v41, %v2477_v40  ;;  %v1096_v9 = vrot.slane %v2807_v41, %v2480_v42  ;;  %v205_v60 = vadd.f32 1.0, %v2122_v5  ;;  %v2124_v43 = vpop.eup %2123 }
 0x5ae   :  { %v1114_v38 = vmul.f32 %v1080_v25, %v1065_v30  ;;  %v1113_v12 = vmul.f32 %v1076_v36, %v1064_v23  ;;  %v1115_v50 = vmul.f32 %v1084_v29, %v1066_v3  ;;  %v1116_v27 = vmul.f32 %v1088_v14, %v1067_v52 }
 0x5af   :  { %v1117_v16 = vmul.f32 %v1092_v32, %v1068_v8  ;;  %v1118_v61 = vmul.f32 %v1096_v9, %v1069_v7  ;;  %2125 = vlog2.f32 %v205_v60  ;;  %v935_v23 = vmul.f32 %v2124_v43, %v2784_v58 }
 0x5b0   :  { %1138 = vperm.xlu1 %2040, %v1114_v38   ;;  %1135 = vperm.xlu0 %2039, %v1113_v12   ;;  %v1554_v25 = vmul.f32 %v1552_v1, %v2800_v54  ;;  %v208_v38 = vmul.f32 -0.5, %v2122_v5  ;;  %v211_v3 = vand.u32 2147483647, %v2122_v5  ;;  %v1104_v58 = vrot.slane %v2807_v41, %v2499_v62 }
 0x5b1   :  { %v161_v52 = vmax.f32 %v2651_v15, 0.0 }
 0x5b2   :  { %v1555_v36 = vadd.f32 %v1554_v25, %v935_v23  ;;  %v209_v12 = vadd.f32 1.0, %v208_v38  ;;  %vm212_vm1 = vcmp.lt.f32.partialorder %v211_v3, 0.0004427343 }
 0x5b4   :  { %1141 = vperm.xlu1 %2040, %v1115_v50   ;;  %2042 = vset.pattern.permute.xlu0 %v2262_v46  ;;  %v210_v50 = vmul.f32 %v2122_v5, %v209_v12 }
 0x5b5   :  { %1570 = vperm.xlu0 %2042, %v318_v37   ;;  %v1100_v37 = vrot.slane %v2807_v41, %v2493_v53  ;;  %v266_v41 = vsel %vm3097_vm5, %v2651_v15, -inf }
 0x5b7   :  { %v1119_v30 = vmul.f32 %v1100_v37, %v1070_v0 }
 0x5b8   :  { %1144 = vperm.xlu1 %2040, %v1116_v27  }
 0x5b9   :  { %2043 = vset.pattern.permute.xlu0 %v2263_v48 }
 0x5ba   :  { %1598 = vperm.xlu0 %2043, %v256_v6  }
 0x5bc   :  { %1147 = vperm.xlu1 %2040, %v1117_v16   ;;  %v2126_v29 = vpop.eup %2125 }
 0x5bd   :  { %v207_v31 = vmul.f32 0.6931472, %v2126_v29 }
 0x5be   :  { %2044 = vset.pattern.permute.xlu0 %v2258_v2 }
 0x5bf   :  { %v213_v27 = vsel %vm212_vm1, %v210_v50, %v207_v31 }
 0x5c0   :  { %1150 = vperm.xlu1 %2040, %v1118_v61   ;;  %v225_v13 = vadd.f32 %v213_v27, %v161_v52 }
 0x5c2   :  { %v2848_v5 = vsel %vm165_vm4, %v2651_v15, %v225_v13 }
 0x5c4   :  { %1153 = vperm.xlu1 %2040, %v1119_v30  }
 0x5c8   :  { %1557 = vrot.lane.b32.xlu1 %v1555_v36, %s2264_s0 }
 0x5cc   :  { %1560 = vrot.lane.b32.xlu1 %v1555_v36, %s2265_s27 }
 0x5d0   :  { %1563 = vrot.lane.b32.xlu1 %v1555_v36, %s2266_s28  ;;  %v1057_v14 = vpop.xlane.xlu0 %1056 }
 0x5d1   :  { %v1071_v54 = vmul.f32 %v2496_v59, %v1057_v14 }
 0x5d3   :  { %v1120_v32 = vmul.f32 %v1104_v58, %v1071_v54 }
 0x5d5   :  { %1156 = vperm.xlu1 %2040, %v1120_v32  }
 0x5d9   :  { %2041 = vset.pattern.permute.xlu1 %v2257_v24 }
 0x5da   :  { %1123 = vperm.xlu1 %2041, %v2848_v5  }
 0x5de   :  { %2046 = vset.pattern.permute.xlu1 %v2260_v35 }
 0x5fe   :  { %267 = vmax.xlane.f32.xlu1 %v266_v41 }
 0x61f   :  { %v1577_v6 = vpop.permute.xlu1 %1576 }
 0x624   :  { %v1587_v8 = vpop.permute.xlu1 %1586 }
 0x62b   :  { %v1139_v16 = vpop.permute.xlu1 %1138  ;;  %v1136_v36 = vpop.permute.xlu0 %1135 }
 0x62c   :  { %v1165_v38 = vrot.slane %v1139_v16, %v2510_v18  ;;  %v1161_v12 = vrot.slane %v1136_v36, %v2510_v18 }
 0x62e   :  { %v1190_v14 = vsel %vm3108_vm0, %v1165_v38, %v1161_v12 }
 0x62f   :  { %v1142_v9 = vpop.permute.xlu1 %1141 }
 0x630   :  { %v1169_v29 = vrot.slane %v1142_v9, %v2510_v18 }
 0x632   :  { %v1191_v54 = vsel %vm3109_vm12, %v1169_v29, %v1190_v14 }
 0x633   :  { %v1145_v60 = vpop.permute.xlu1 %1144 }
 0x634   :  { %v1173_v3 = vrot.slane %v1145_v60, %v2510_v18 }
 0x636   :  { %v1192_v27 = vsel %vm3110_vm7, %v1173_v3, %v1191_v54 }
 0x637   :  { %v1148_v7 = vpop.permute.xlu1 %1147 }
 0x638   :  { %v1177_v50 = vrot.slane %v1148_v7, %v2510_v18 }
 0x63a   :  { %v1193_v13 = vsel %vm3111_vm8, %v1177_v50, %v1192_v27  ;;  %v2182_v27 = vld [vmem:[%s3085_s2] sm:$0xff] }
 0x63b   :  { %v1151_v63 = vpop.permute.xlu1 %1150 }
 0x63c   :  { %v1181_v58 = vrot.slane %v1151_v63, %v2510_v18 }
 0x63e   :  { %v1194_v41 = vsel %vm3112_vm15, %v1181_v58, %v1193_v13 }
 0x63f   :  { %v1154_v61 = vpop.permute.xlu1 %1153 }
 0x640   :  { %v1185_v52 = vrot.slane %v1154_v61, %v2510_v18 }
 0x643   :  { %v1558_v37 = vpop.permute.xlu1 %1557 }
 0x647   :  { %v1561_v43 = vpop.permute.xlu1 %1560 }
 0x648   :  { %v1566_v0 = vsel %vm3106_vm11, %v1558_v37, %v1561_v43  ;;  %v1571_v43 = vpop.permute.xlu0 %1570 }
 0x64b   :  { %v1564_v1 = vpop.permute.xlu1 %1563 }
 0x64c   :  { %v1567_v23 = vsel %vm3107_vm3, %v1566_v0, %v1564_v1  ;;  %v2882_v0 = vpop.permute.xlu0 %1598 }
 0x64d   :  { %v1579_v30 = vmul.f32 %v1577_v6, %v1567_v23  ;;  %v1589_v25 = vmul.f32 %v1587_v8, %v1567_v23  ;;  %v1195_v8 = vsel %vm3113_vm10, %v1185_v52, %v1194_v41  ;;  %v1852_v3 = vand.u32 2147483647, %v2882_v0 }
 0x64e   :  { %v1857_v58 = vtrunc.f32 %v2882_v0  ;;  %vm1856_vm0 = vcmp.lt.f32.partialorder %v2882_v0, 0 }
 0x64f   :  { %1581 = vrot.lane.b32.xlu0 %v1579_v30, %s2267_s29  ;;  %v1573_v30 = vmul.f32 %v1571_v43, %v1567_v23  ;;  %vm1853_vm9 = vcmp.eq.f32.partialorder %v1852_v3, 2139095040  ;;  %v1888_v41 = vsel %vm1856_vm0, 0, %v2269_v39 }
 0x650   :  { %v1157_v31 = vpop.permute.xlu1 %1156  ;;  %vm1858_vm1 = vcmp.ne.f32.partialorder %v2882_v0, %v1857_v58 }
 0x651   :  { %v1189_v32 = vrot.slane %v1157_v31, %v2510_v18  ;;  %v1861_v31 = vtrunc.f32 %v1852_v3  ;;  %vm1859_vm4 = vmor %vm1858_vm1, %vm1853_vm9 }
 0x652   :  { %vm1865_vm12 = vmneg %vm1859_vm4 }
 0x653   :  { %1591 = vrot.lane.b32.xlu0 %v1589_v25, %s2268_s30  ;;  %v1196_v16 = vsel %vm3114_vm6, %v1189_v32, %v1195_v8  ;;  %v1862_v54 = vcvt.f32.s32 %v1861_v31  ;;  %v1876_v8 = vsel %vm1856_vm0, 2139095040, %v2256_v21 }
 0x655   :  { %v1124_v6 = vpop.permute.xlu1 %1123  ;;  %v1863_v23 = vand.u32 1, %v1862_v54 }
 0x656   :  { %v2873_v9 = vmul.f32 %v1196_v16, %v1124_v6 }
 0x657   :  { %vm1864_vm3 = vcmp.eq.s32.totalorder %v1863_v23, 1 }
 0x658   :  { %v1199_v60 = vsel %vm3099_vm13, %v2873_v9, -inf  ;;  %vm1866_vm15 = vmand %vm1864_vm3, %vm1865_vm12 }
 0x672   :  { %1200 = vmax.xlane.f32.xlu0 %v1199_v60 }
 0x687   :  { %v268_v7 = vpop.xlane.xlu1 %267 }
 0x688   :  { %v274_v63 = vsub.f32 %v2651_v15, %v268_v7 }
 0x68a   :  { %v280_v61 = vmul.f32 1.442695, %v274_v63  ;;  %v1889_v63 = vxor.u32 2147483648, %v1888_v41 }
 0x68c   :  { %2127 = vpow2.f32 %v280_v61 }
 0x699   :  { %v2878_v37 = vpop.eup %2127 }
 0x69a   :  { %292 = vrot.lane.b32.xlu1 %v2878_v37, %s2259_s26 }
 0x6c1   :  { %v1582_v1 = vpop.permute.xlu0 %1581 }
 0x6c2   :  { %v1584_v25 = vadd.f32 %v1582_v1, %v1573_v30 }
 0x6c5   :  { %v1592_v36 = vpop.permute.xlu0 %1591 }
 0x6c6   :  { %v1594_v38 = vadd.f32 %v1592_v36, %v1584_v25 }
 0x6c8   :  { %v1595_v12 = vmax.f32 %v1594_v38, 1e-06 }
 0x6ca   :  { %v1848_v29 = vand.u32 2147483647, %v1595_v12  ;;  %vm1869_vm7 = vcmp.eq.f32.partialorder %v1595_v12, 0  ;;  %vm1868_vm10 = vcmp.lt.f32.partialorder %v1595_v12, 0  ;;  %vm1871_vm3 = vcmp.lt.s32.totalorder %v1595_v12, 0 }
 0x6cb   :  { %vm1881_vm6 = vmand %vm1856_vm0, %vm1869_vm7  ;;  %vm1870_vm14 = vcmp.eq.f32.partialorder %v1595_v12, 1065353216 }
 0x6cc   :  { %2129 = vlog2.f32 %v1848_v29  ;;  %vm1872_vm11 = vcmp.gt.f32.partialorder %v1848_v29, 1065353216  ;;  %vm1874_vm5 = vmand %vm1868_vm10, %vm1859_vm4 }
 0x6cd   :  { %2131 = vtanh.f32 %v2649_v49  ;;  %vm2895_vm8 = vmxor %vm1856_vm0, %vm1872_vm11  ;;  %vm1860_vm11 = vcmp.lt.f32.partialorder %v1852_v3, 1266679808  ;;  %vm1894_vm0 = vcmp.ne.f32.partialorder %v2882_v0, %v2882_v0 }
 0x6ce   :  { %vm1883_vm1 = vmor %vm1881_vm6, %vm2895_vm8  ;;  %vm1885_vm8 = vcmp.eq.f32.partialorder %v1595_v12, 3212836864  ;;  %vm1893_vm6 = vcmp.ne.f32.partialorder %v1595_v12, %v1595_v12 }
 0x6cf   :  { %vm1867_vm12 = vmand %vm1860_vm11, %vm1866_vm15  ;;  %v1884_v60 = vsel %vm1883_vm1, 2139095040, %v2256_v21  ;;  %vm1855_vm11 = vcmp.eq.f32.partialorder %v2882_v0, 1065353216 }
 0x6d0   :  { %vm1878_vm4 = vmand %vm1871_vm3, %vm1867_vm12  ;;  %v1886_v30 = vsel %vm1885_vm8, 1065353216, %v1884_v60  ;;  %v1890_v25 = vsel %vm1867_vm12, %v1889_v63, %v1888_v41  ;;  %vm3119_vm3 = vcmask 7168   ;;  %vm3120_vm12 = vcmask 72704  }
 0x6d1   :  { %v1891_v38 = vsel %vm1868_vm10, %v1890_v25, %v1888_v41  ;;  %vm1895_vm15 = vmor %vm1893_vm6, %vm1894_vm0  ;;  %vm3118_vm10 = vcmask 171152   ;;  %vm3122_vm8 = vcmask 1042434   ;;  %vm3123_vm6 = vcmask 1043459  }
 0x6d2   :  { %vm3125_vm0 = vcmask 1045509  }
 0x6d9   :  { %v2130_v50 = vpop.eup %2129 }
 0x6da   :  { %v1850_v14 = vmul.f32 %v2130_v50, %v2882_v0  ;;  %v2891_v52 = vpop.eup %2131 }
 0x6db   :  { %v1218_v32 = vrot.slane %v2891_v52, %v2384_v33  ;;  %v1211_v54 = vcombine.high %v2891_v52, %v2891_v52 }
 0x6dc   :  { %2133 = vpow2.f32 %v1850_v14 }
 0x6dd   :  { %v1234_v61 = vrot.slane %v1218_v32, %v2384_v33  ;;  %v1226_v43 = vcombine.high %v1218_v32, %v1218_v32 }
 0x6df   :  { %v1263_v50 = vrot.slane %v1234_v61, %v2398_v44  ;;  %v1248_v14 = vrot.slane %v1226_v43, %v2384_v33  ;;  %v1256_v41 = vcombine.high %v1234_v61, %v1234_v61 }
 0x6e1   :  { %v1300_v32 = vmul.f32 %v2182_v27, %v1263_v50  ;;  %v1258_v60 = vcombine.high %v1248_v14, %v1248_v14 }
 0x6e9   :  { %v2134_v13 = vpop.eup %2133 }
 0x6ea   :  { %v1875_v6 = vsel %vm1874_vm5, 2143289344, %v2134_v13  ;;  %vm1873_vm5 = vcmp.eq.f32.partialorder %v1848_v29, 2139095040  ;;  %v1267_v13 = vrot.slane %v1248_v14, %v2398_v44 }
 0x6eb   :  { %v1877_v16 = vsel %vm1869_vm7, %v1876_v8, %v1875_v6  ;;  %vm1854_vm7 = vcmp.eq.f32.partialorder %v2882_v0, 0  ;;  %v1225_v0 = vrot.slane %v1211_v54, %v2384_v33  ;;  %v2183_v6 = vld [vmem:[%s3085_s2 + $0x8] sm:$0xff] }
 0x6ec   :  { %v1879_v7 = vxor.u32 2147483648, %v1877_v16  ;;  %vm1897_vm1 = vmor %vm1870_vm14, %vm1854_vm7  ;;  %v1301_v8 = vmul.f32 %v2183_v6, %v1267_v13  ;;  %vm3117_vm14 = vcmask 23552   ;;  %vm3126_vm7 = vcmask 1046534  }
 0x6ed   :  { %v1241_v63 = vrot.slane %v1225_v0, %v2384_v33  ;;  %v1227_v43 = vcombine.high %v1225_v0, %v1225_v0 }
 0x6ee   :  { %v1880_v1 = vsel %vm1878_vm4, %v1879_v7, %v1877_v16  ;;  %v1271_v16 = vrot.slane %v1256_v41, %v2398_v44  ;;  %vm3121_vm4 = vcmask 1041409  }
 0x6ef   :  { %v1887_v36 = vsel %vm1853_vm9, %v1886_v30, %v1880_v1  ;;  %v1311_v1 = vsel %vm337_vm2, %v1301_v8, 0.0  ;;  %v2184_v30 = vld [vmem:[%s3085_s2 + $0x10] sm:$0xff]  ;;  %v1279_v14 = vrot.slane %v1241_v63, %v2398_v44  ;;  %v1257_v27 = vcombine.high %v1241_v63, %v1241_v63  ;;  %s2270_s2 = smov [#allocation7]  }
 0x6f0   :  { %v1892_v31 = vsel %vm1873_vm5, %v1891_v38, %v1887_v36  ;;  %v1302_v25 = vmul.f32 %v2184_v30, %v1271_v16  ;;  %v1275_v36 = vrot.slane %v1258_v60, %v2398_v44  ;;  %v1332_v60 = vmul.f32 %v2891_v52, %v2891_v52  ;;  %s1739_s21 = sshll.u32 %s2270_s2, 4  ;;  %s1740_s21 = int_to_ptr.vmem [resolvable:$true] %s1739_s21 }
 0x6f1   :  { %v1896_v58 = vsel %vm1895_vm15, 2143289344, %v1892_v31  ;;  %v1304_v54 = vmul.f32 %v2761_v22, %v1279_v14  ;;  %v1287_v13 = vrot.slane %v1257_v27, %v2398_v44  ;;  %v174_v52 = vand.u32 2147483647, %v2649_v49  ;;  %s2225_s22 = scalar_lea.vmem %s1740_s21, 512  ;;  %p2230_p11 = scmp.lt.s32.totalorder %s1740_s21, %s1740_s21 }
 0x6f2   :  { %v1898_v29 = vsel %vm1897_vm1, 1065353216, %v1896_v58  ;;  %v1314_v31 = vsel %vm337_vm2, %v1302_v25, 0.0  ;;  %v1303_v50 = vmul.f32 %v2750_v10, %v1275_v36  ;;  %v1255_v58 = vrot.slane %v1227_v43, %v2384_v33  ;;  %p2226_p10 = scmp.ne.s32.totalorder %s1740_s21, %s2225_s22  ;;  %p2231_p12 = scmp.lt.s32.totalorder %s2225_s22, %s2225_s22 }
 0x6f3   :  { %v2924_v3 = vsel %vm1855_vm11, %v1595_v12, %v1898_v29  ;;  %v1308_v12 = vsel %vm337_vm2, %v1300_v32, 0.0  ;;  %v1320_v32 = vsel %vm337_vm2, %v1304_v54, 0.0  ;;  %v1306_v0 = vmul.f32 %v2778_v20, %v1287_v13 }
 0x6f4   :  { %v1602_v23 = vsel %vm3099_vm13, %v2924_v3, 0.0  ;;  %v1317_v29 = vsel %vm337_vm2, %v1303_v50, 0.0  ;;  %v1259_v33 = vcombine.high %v1255_v58, %v1255_v58  ;;  %v1333_v63 = vsel %vm337_vm2, %v1332_v60, 0.0  ;;  %p2232_p13 = por %p2231_p12, %p2230_p11 }
 0x6f5   :  { %1603 = vadd.xlane.f32.xlu1 %v1602_v23  ;;  %v1283_v23 = vrot.slane %v1255_v58, %v2398_v44  ;;  %v1326_v8 = vsel %vm337_vm2, %v1306_v0, 0.0  ;;  %v178_v36 = vsub.f32 0.0, %v174_v52  ;;  %vm166_vm9 = vcmp.ne.f32.partialorder %v2649_v49, %v2649_v49 }
 0x6f6   :  { %v1291_v22 = vrot.slane %v1259_v33, %v2398_v44  ;;  %vm3124_vm5 = vcmask 1044484   ;;  %vm3127_vm15 = vcmask 1047559   ;;  %p2233_p0 = pnand %p2232_p13, %p2226_p10 }
 0x6f7   :  { %v1305_v10 = vmul.f32 %v2769_v26, %v1283_v23 }
 0x6f8   :  { %v1307_v26 = vmul.f32 %v2796_v47, %v1291_v22 }
 0x6f9   :  { %1309 = vadd.xlane.f32.xlu1 %v1308_v12 }
 0x6fa   :  { %v1329_v20 = vsel %vm337_vm2, %v1307_v26, 0.0 }
 0x6fb   :  { %v1201_v7 = vpop.xlane.xlu0 %1200 }
 0x6fc   :  { %v1202_v61 = vsub.f32 %v2873_v9, %v1201_v7  ;;  %v1759_v9 = vmul.f32 -1.442695, %v2651_v15  ;;  %v1323_v15 = vsel %vm337_vm2, %v1305_v10, 0.0 }
 0x6fd   :  { %1312 = vadd.xlane.f32.xlu1 %v1311_v1 }
 0x6fe   :  { %v1203_v38 = vmul.f32 1.442695, %v1202_v61 }
 0x700   :  { %2135 = vpow2.f32 %v1203_v38 }
 0x701   :  { %1315 = vadd.xlane.f32.xlu1 %v1314_v31  ;;  %2137 = vpow2.f32 %v1759_v9  ;;  %v185_v31 = vmul.f32 1.442695, %v178_v36 }
 0x705   :  { %1318 = vadd.xlane.f32.xlu1 %v1317_v29 }
 0x709   :  { %1321 = vadd.xlane.f32.xlu1 %v1320_v32 }
 0x70c   :  { %v293_v41 = vpop.permute.xlu1 %292 }
 0x70d   :  { %1324 = vadd.xlane.f32.xlu1 %v1323_v15  ;;  %v307_v12 = vsel %vm3117_vm14, %v293_v41, 0.0  ;;  %v2136_v6 = vpop.eup %2135 }
 0x70e   :  { %308 = vadd.xlane.f32.xlu0 %v307_v12  ;;  %v1205_v16 = vsel %vm3099_vm13, %v2136_v6, 0.0  ;;  %v2138_v7 = vpop.eup %2137 }
 0x70f   :  { %v245_v43 = vadd.f32 1.0, %v2138_v7 }
 0x711   :  { %1327 = vadd.xlane.f32.xlu1 %v1326_v8  ;;  %2139 = vrcp.f32 %v245_v43 }
 0x712   :  { %1206 = vadd.xlane.f32.xlu0 %v1205_v16 }
 0x715   :  { %1330 = vadd.xlane.f32.xlu1 %v1329_v20 }
 0x716   :  { %1334 = vadd.xlane.f32.xlu0 %v1333_v63 }
 0x71e   :  { %v2140_v61 = vpop.eup %2139 }
 0x71f   :  { %v1610_v1 = vsub.f32 1.0, %v2140_v61 }
 0x72c   :  { %1613 = vperm.xlu0 %2044, %v1610_v1  }
 0x730   :  { %2045 = vset.pattern.permute.xlu0 %v2261_v4 }
 0x77e   :  { %v1604_v47 = vpop.xlane.xlu1 %1603 }
 0x77f   :  { %v1605_v30 = vadd.f32 1e-06, %v1604_v47 }
 0x781   :  { %2141 = vrcp.f32 %v1605_v30 }
 0x782   :  { %v1310_v50 = vpop.xlane.xlu1 %1309  ;;  %2143 = vpow2.f32 %v185_v31 }
 0x783   :  { %v1338_v8 = vmul.f32 %v2434_v55, %v1310_v50 }
 0x786   :  { %v1313_v58 = vpop.xlane.xlu1 %1312 }
 0x787   :  { %v1339_v43 = vmul.f32 %v2439_v57, %v1313_v58  ;;  %v162_v58 = vmax.f32 %v2649_v49, 0.0 }
 0x78a   :  { %v1316_v29 = vpop.xlane.xlu1 %1315 }
 0x78b   :  { %v1340_v20 = vmul.f32 %v2453_v17, %v1316_v29 }
 0x78e   :  { %v2142_v25 = vpop.eup %2141  ;;  %v1319_v10 = vpop.xlane.xlu1 %1318 }
 0x78f   :  { %v1607_v38 = vmul.f32 %v2142_v25, %v2924_v3  ;;  %v2144_v27 = vpop.eup %2143  ;;  %v1341_v30 = vmul.f32 %v2468_v28, %v1319_v10 }
 0x790   :  { %v214_v33 = vadd.f32 1.0, %v2144_v27  ;;  %v217_v7 = vmul.f32 -0.5, %v2144_v27  ;;  %v220_v17 = vand.u32 2147483647, %v2144_v27 }
 0x791   :  { %1609 = vst.msk [vmem:[#allocation7 + $0x8] sm:$0xff] %vm3099_vm13, %v1607_v38 }
 0x792   :  { %v1322_v22 = vpop.xlane.xlu1 %1321  ;;  %v218_v1 = vadd.f32 1.0, %v217_v7  ;;  %vm221_vm2 = vcmp.lt.f32.partialorder %v220_v17, 0.0004427343 }
 0x793   :  { %v1342_v25 = vmul.f32 %v2470_v34, %v1322_v22 }
 0x796   :  { %v1325_v16 = vpop.xlane.xlu1 %1324 }
 0x797   :  { %v309_v14 = vpop.xlane.xlu0 %308 }
 0x798   :  { %2145 = vrcp.f32 %v309_v14 }
 0x79b   :  { %v1207_v9 = vpop.xlane.xlu0 %1206 }
 0x79c   :  { %2147 = vrcp.f32 %v1207_v9 }
 0x79f   :  { %v1335_v54 = vpop.xlane.xlu0 %1334 }
 0x7a0   :  { %v1336_v23 = vmax.f32 %v1335_v54, 1e-16 }
 0x7a2   :  { %2149 = vrsqrt.f32 %v1336_v23 }
 0x7a3   :  { %2151 = vlog2.f32 %v214_v33 }
 0x7a5   :  { %v2146_v32 = vpop.eup %2145 }
 0x7a6   :  { %v2974_v13 = vmul.f32 %v2146_v32, %v2878_v37 }
 0x7a7   :  { %v1614_v3 = vpop.permute.xlu0 %1613 }
 0x7a8   :  { %1648 = vperm.xlu1 %2046, %v2974_v13   ;;  %1638 = vperm.xlu0 %2045, %v2974_v13   ;;  %v1616_v0 = vmul.f32 %v1614_v3, %v1607_v38  ;;  %v219_v38 = vmul.f32 %v2144_v27, %v218_v1 }
 0x7a9   :  { %v2148_v41 = vpop.eup %2147 }
 0x7aa   :  { %v1209_v15 = vmul.f32 %v2148_v41, %v2136_v6 }
 0x7ac   :  { %v1617_v12 = vadd.f32 %v1616_v0, %v1209_v15  ;;  %2047 = vset.pattern.permute.xlu1 %v2256_v21  ;;  %2048 = vset.pattern.permute.xlu0 %v2256_v21 }
 0x7ae   :  { %1619 = vrot.lane.b32.xlu0 %v1617_v12, %s2264_s0 }
 0x7af   :  { %v2150_v37 = vpop.eup %2149 }
 0x7b0   :  { %v1350_v26 = vrot.slane %v2150_v37, %v2398_v44  ;;  %v1358_v6 = vrot.slane %v2150_v37, %v2451_v11  ;;  %v1354_v63 = vrot.slane %v2150_v37, %v2437_v56  ;;  %v1362_v55 = vrot.slane %v2150_v37, %v2456_v19  ;;  %v1328_v44 = vpop.xlane.xlu1 %1327  ;;  %v2152_v47 = vpop.eup %2151 }
 0x7b1   :  { %v1366_v52 = vrot.slane %v2150_v37, %v2477_v40  ;;  %v1370_v57 = vrot.slane %v2150_v37, %v2480_v42  ;;  %v216_v36 = vmul.f32 0.6931472, %v2152_v47  ;;  %v1343_v19 = vmul.f32 %v2483_v45, %v1325_v16 }
 0x7b2   :  { %1622 = vrot.lane.b32.xlu0 %v1617_v12, %s2265_s27  ;;  %v1387_v60 = vmul.f32 %v1350_v26, %v1338_v8  ;;  %v1389_v61 = vmul.f32 %v1358_v6, %v1340_v20  ;;  %v1388_v11 = vmul.f32 %v1354_v63, %v1339_v43  ;;  %v1390_v56 = vmul.f32 %v1362_v55, %v1341_v30 }
 0x7b3   :  { %v1391_v31 = vmul.f32 %v1366_v52, %v1342_v25  ;;  %v1374_v50 = vrot.slane %v2150_v37, %v2493_v53  ;;  %v1344_v14 = vmul.f32 %v2490_v51, %v1328_v44  ;;  %v1392_v40 = vmul.f32 %v1370_v57, %v1343_v19 }
 0x7b4   :  { %1409 = vperm.xlu1 %2047, %v1387_v60   ;;  %v1331_v28 = vpop.xlane.xlu1 %1330  ;;  %v1378_v34 = vrot.slane %v2150_v37, %v2499_v62  ;;  %v222_v9 = vsel %vm221_vm2, %v219_v38, %v216_v36  ;;  %v257_v53 = vadd.f32 1.0, %v2848_v5 }
 0x7b5   :  { %v1345_v42 = vmul.f32 %v2496_v59, %v1331_v28  ;;  %v1393_v29 = vmul.f32 %v1374_v50, %v1344_v14  ;;  %v226_v54 = vadd.f32 %v222_v9, %v162_v58 }
 0x7b6   :  { %1625 = vrot.lane.b32.xlu0 %v1617_v12, %s2266_s28 }
 0x7b7   :  { %v1394_v45 = vmul.f32 %v1378_v34, %v1345_v42  ;;  %v3004_v51 = vsel %vm166_vm9, %v2649_v49, %v226_v54 }
 0x7b8   :  { %1415 = vperm.xlu1 %2047, %v1389_v61  }
 0x7ba   :  { %1412 = vperm.xlu0 %2048, %v1388_v11  }
 0x7bc   :  { %1418 = vperm.xlu1 %2047, %v1390_v56  }
 0x7be   :  { %1421 = vperm.xlu0 %2048, %v1391_v31  }
 0x7c0   :  { %1424 = vperm.xlu1 %2047, %v1392_v40  }
 0x7c2   :  { %1427 = vperm.xlu0 %2048, %v1393_v29  }
 0x7c4   :  { %1430 = vperm.xlu1 %2047, %v1394_v45  }
 0x7c6   :  { %2049 = vset.pattern.permute.xlu0 %v2257_v24  ;;  %v269_v24 = vsel %vm3118_vm10, %v2649_v49, -inf }
 0x7c7   :  { %1397 = vperm.xlu0 %2049, %v3004_v51  }
 0x7c8   :  { %2053 = vset.pattern.permute.xlu1 %v2261_v4 }
 0x7cb   :  { %2050 = vset.pattern.permute.xlu0 %v2262_v46 }
 0x7cc   :  { %1632 = vperm.xlu0 %2050, %v2974_v13  }
 0x7d0   :  { %2051 = vset.pattern.permute.xlu0 %v2263_v48 }
 0x7d1   :  { %1660 = vperm.xlu0 %2051, %v257_v53  }
 0x7d5   :  { %2052 = vset.pattern.permute.xlu0 %v2258_v2 }
 0x7e8   :  { %270 = vmax.xlane.f32.xlu1 %v269_v24 }
 0x823   :  { %v1639_v59 = vpop.permute.xlu0 %1638  ;;  %v1649_v23 = vpop.permute.xlu1 %1648 }
 0x827   :  { %v1620_v62 = vpop.permute.xlu0 %1619 }
 0x82b   :  { %v1623_v27 = vpop.permute.xlu0 %1622 }
 0x82c   :  { %v1628_v4 = vsel %vm3119_vm3, %v1620_v62, %v1623_v27 }
 0x82f   :  { %v1410_v32 = vpop.permute.xlu1 %1409  ;;  %v1626_v10 = vpop.permute.xlu0 %1625 }
 0x830   :  { %v1629_v13 = vsel %vm3120_vm12, %v1628_v4, %v1626_v10  ;;  %v1435_v15 = vrot.slane %v1410_v32, %v2510_v18 }
 0x831   :  { %v1641_v5 = vmul.f32 %v1639_v59, %v1629_v13  ;;  %v1651_v3 = vmul.f32 %v1649_v23, %v1629_v13 }
 0x833   :  { %1643 = vrot.lane.b32.xlu0 %v1641_v5, %s2267_s29  ;;  %v1416_v33 = vpop.permute.xlu1 %1415 }
 0x834   :  { %v1443_v12 = vrot.slane %v1416_v33, %v2510_v18 }
 0x835   :  { %v1413_v2 = vpop.permute.xlu0 %1412 }
 0x836   :  { %v1439_v41 = vrot.slane %v1413_v2, %v2510_v18 }
 0x837   :  { %1653 = vrot.lane.b32.xlu0 %v1651_v3, %s2268_s30  ;;  %v1419_v0 = vpop.permute.xlu1 %1418 }
 0x838   :  { %v1464_v22 = vsel %vm3121_vm4, %v1439_v41, %v1435_v15  ;;  %v1447_v37 = vrot.slane %v1419_v0, %v2510_v18 }
 0x839   :  { %v1422_v8 = vpop.permute.xlu0 %1421  ;;  %v1465_v26 = vsel %vm3122_vm8, %v1443_v12, %v1464_v22 }
 0x83a   :  { %v1451_v16 = vrot.slane %v1422_v8, %v2510_v18  ;;  %v1466_v6 = vsel %vm3123_vm6, %v1447_v37, %v1465_v26  ;;  %v1760_v26 = vmul.f32 -1.442695, %v2649_v49 }
 0x83b   :  { %v1425_v60 = vpop.permute.xlu1 %1424 }
 0x83c   :  { %v1455_v7 = vrot.slane %v1425_v60, %v2510_v18  ;;  %v1467_v63 = vsel %vm3124_vm5, %v1451_v16, %v1466_v6 }
 0x83d   :  { %v1428_v20 = vpop.permute.xlu0 %1427 }
 0x83e   :  { %v1459_v43 = vrot.slane %v1428_v20, %v2510_v18  ;;  %v1468_v55 = vsel %vm3125_vm0, %v1455_v7, %v1467_v63 }
 0x83f   :  { %v1431_v61 = vpop.permute.xlu1 %1430 }
 0x840   :  { %v1463_v44 = vrot.slane %v1431_v61, %v2510_v18  ;;  %v1469_v1 = vsel %vm3126_vm7, %v1459_v43, %v1468_v55 }
 0x842   :  { %v1470_v47 = vsel %vm3127_vm15, %v1463_v44, %v1469_v1  ;;  %v1398_v30 = vpop.permute.xlu0 %1397 }
 0x843   :  { %v3034_v11 = vmul.f32 %v1470_v47, %v1398_v30 }
 0x845   :  { %v1473_v52 = vsel %vm3099_vm13, %v3034_v11, -inf }
 0x847   :  { %v1633_v18 = vpop.permute.xlu0 %1632 }
 0x848   :  { %v1635_v19 = vmul.f32 %v1633_v18, %v1629_v13 }
 0x84c   :  { %v1661_v36 = vpop.permute.xlu0 %1660 }
 0x84d   :  { %v1904_v34 = vand.u32 2147483647, %v1661_v36  ;;  %v1909_v29 = vtrunc.f32 %v1661_v36  ;;  %vm1908_vm10 = vcmp.lt.f32.partialorder %v1661_v36, 0 }
 0x84e   :  { %v1940_v24 = vsel %vm1908_vm10, 0, %v2269_v39  ;;  %v1928_v62 = vsel %vm1908_vm10, 2139095040, %v2256_v21 }
 0x84f   :  { %v1913_v58 = vtrunc.f32 %v1904_v34  ;;  %vm1905_vm1 = vcmp.eq.f32.partialorder %v1904_v34, 2139095040  ;;  %vm1910_vm11 = vcmp.ne.f32.partialorder %v1661_v36, %v1909_v29  ;;  %vm1912_vm15 = vcmp.lt.f32.partialorder %v1904_v34, 1266679808 }
 0x850   :  { %vm1911_vm14 = vmor %vm1910_vm11, %vm1905_vm1  ;;  %v1941_v32 = vxor.u32 2147483648, %v1940_v24 }
 0x851   :  { %v1914_v45 = vcvt.f32.s32 %v1913_v58  ;;  %vm1917_vm3 = vmneg %vm1911_vm14 }
 0x853   :  { %v1915_v54 = vand.u32 1, %v1914_v45 }
 0x855   :  { %vm1916_vm9 = vcmp.eq.s32.totalorder %v1915_v54, 1 }
 0x856   :  { %1474 = vmax.xlane.f32.xlu0 %v1473_v52  ;;  %vm1918_vm8 = vmand %vm1916_vm9, %vm1917_vm3 }
 0x857   :  { %vm1919_vm11 = vmand %vm1912_vm15, %vm1918_vm8  ;;  %vm3132_vm15 = vcmask 7168  }
 0x858   :  { %v1942_v5 = vsel %vm1919_vm11, %v1941_v32, %v1940_v24 }
 0x871   :  { %v271_v17 = vpop.xlane.xlu1 %270 }
 0x872   :  { %v275_v25 = vsub.f32 %v2649_v49, %v271_v17 }
 0x874   :  { %v282_v56 = vmul.f32 1.442695, %v275_v25 }
 0x876   :  { %2153 = vpow2.f32 %v282_v56 }
 0x883   :  { %v3039_v57 = vpop.eup %2153 }
 0x884   :  { %294 = vrot.lane.b32.xlu1 %v3039_v57, %s2259_s26 }
 0x8a5   :  { %v1644_v38 = vpop.permute.xlu0 %1643 }
 0x8a6   :  { %v1646_v31 = vadd.f32 %v1644_v38, %v1635_v19 }
 0x8a9   :  { %v1654_v50 = vpop.permute.xlu0 %1653 }
 0x8aa   :  { %v1656_v28 = vadd.f32 %v1654_v50, %v1646_v31 }
 0x8ac   :  { %v1657_v14 = vmax.f32 %v1656_v28, 1e-06 }
 0x8ae   :  { %v1900_v40 = vand.u32 2147483647, %v1657_v14  ;;  %vm1921_vm12 = vcmp.eq.f32.partialorder %v1657_v14, 0  ;;  %vm1920_vm6 = vcmp.lt.f32.partialorder %v1657_v14, 0  ;;  %vm1923_vm13 = vcmp.lt.s32.totalorder %v1657_v14, 0 }
 0x8af   :  { %vm1933_vm5 = vmand %vm1908_vm10, %vm1921_vm12  ;;  %vm1937_vm9 = vcmp.eq.f32.partialorder %v1657_v14, 3212836864  ;;  %vm1945_vm3 = vcmp.ne.f32.partialorder %v1657_v14, %v1657_v14  ;;  %v1943_v33 = vsel %vm1920_vm6, %v1942_v5, %v1940_v24 }
 0x8b0   :  { %2155 = vlog2.f32 %v1900_v40  ;;  %vm1924_vm2 = vcmp.gt.f32.partialorder %v1900_v40, 1065353216  ;;  %vm1926_vm7 = vmand %vm1920_vm6, %vm1911_vm14  ;;  %vm1925_vm14 = vcmp.eq.f32.partialorder %v1900_v40, 2139095040 }
 0x8b1   :  { %vm1934_vm4 = vmxor %vm1908_vm10, %vm1924_vm2  ;;  %vm1906_vm10 = vcmp.eq.f32.partialorder %v1661_v36, 0 }
 0x8b2   :  { %vm1935_vm0 = vmor %vm1933_vm5, %vm1934_vm4  ;;  %vm1922_vm4 = vcmp.eq.f32.partialorder %v1657_v14, 1065353216  ;;  %vm1946_vm5 = vcmp.ne.f32.partialorder %v1661_v36, %v1661_v36 }
 0x8b3   :  { %v1936_v27 = vsel %vm1935_vm0, 2139095040, %v2256_v21  ;;  %vm1930_vm2 = vmand %vm1923_vm13, %vm1919_vm11  ;;  %vm1907_vm0 = vcmp.eq.f32.partialorder %v1661_v36, 1065353216  ;;  %vm3128_vm13 = vcmask 64512   ;;  %vm3133_vm11 = vcmask 72704  }
 0x8b4   :  { %v1938_v13 = vsel %vm1937_vm9, 1065353216, %v1936_v27  ;;  %vm1949_vm8 = vmor %vm1922_vm4, %vm1906_vm10 }
 0x8b5   :  { %vm3130_vm6 = vmmov %vm3128_vm13 }
 0x8bd   :  { %v2156_v9 = vpop.eup %2155 }
 0x8be   :  { %v1902_v42 = vmul.f32 %v2156_v9, %v1661_v36  ;;  %v258_v36 = vadd.f32 1.0, %v3004_v51 }
 0x8c0   :  { %2157 = vpow2.f32 %v1902_v42 }
 0x8cd   :  { %v2158_v53 = vpop.eup %2157 }
 0x8ce   :  { %v1927_v59 = vsel %vm1926_vm7, 2143289344, %v2158_v53  ;;  %vm3131_vm7 = vmmov %vm3130_vm6 }
 0x8cf   :  { %v1929_v23 = vsel %vm1921_vm12, %v1928_v62, %v1927_v59  ;;  %vm1947_vm12 = vmor %vm1945_vm3, %vm1946_vm5 }
 0x8d0   :  { %v1931_v4 = vxor.u32 2147483648, %v1929_v23 }
 0x8d2   :  { %v1932_v10 = vsel %vm1930_vm2, %v1931_v4, %v1929_v23 }
 0x8d3   :  { %v1939_v3 = vsel %vm1905_vm1, %v1938_v13, %v1932_v10  ;;  %vm3129_vm1 = vcmask 23552  }
 0x8d4   :  { %v1944_v2 = vsel %vm1925_vm14, %v1943_v33, %v1939_v3 }
 0x8d5   :  { %v1948_v41 = vsel %vm1947_vm12, 2143289344, %v1944_v2 }
 0x8d6   :  { %v1950_v15 = vsel %vm1949_vm8, 1065353216, %v1948_v41 }
 0x8d7   :  { %v1951_v0 = vsel %vm1907_vm0, %v1657_v14, %v1950_v15 }
 0x8d8   :  { %v1664_v22 = vsel %vm3128_vm13, %v1951_v0, 0.0 }
 0x8d9   :  { %1665 = vadd.xlane.f32.xlu1 %v1664_v22 }
 0x8df   :  { %v1475_v12 = vpop.xlane.xlu0 %1474 }
 0x8e0   :  { %v1476_v37 = vsub.f32 %v3034_v11, %v1475_v12 }
 0x8e2   :  { %v1477_v8 = vmul.f32 1.442695, %v1476_v37 }
 0x8e4   :  { %2159 = vpow2.f32 %v1477_v8 }
 0x8e5   :  { %2161 = vpow2.f32 %v1760_v26 }
 0x8f1   :  { %v2160_v6 = vpop.eup %2159 }
 0x8f2   :  { %v2162_v7 = vpop.eup %2161  ;;  %v1479_v20 = vsel %vm3130_vm6, %v2160_v6, 0.0 }
 0x8f3   :  { %v246_v63 = vadd.f32 1.0, %v2162_v7 }
 0x8f5   :  { %2163 = vrcp.f32 %v246_v63 }
 0x8f6   :  { %v295_v16 = vpop.permute.xlu1 %294 }
 0x8f7   :  { %v310_v60 = vsel %vm3129_vm1, %v295_v16, 0.0 }
 0x8f8   :  { %311 = vadd.xlane.f32.xlu0 %v310_v60 }
 0x8fc   :  { %1480 = vadd.xlane.f32.xlu0 %v1479_v20 }
 0x902   :  { %v2164_v43 = vpop.eup %2163 }
 0x903   :  { %v1672_v61 = vsub.f32 1.0, %v2164_v43 }
 0x912   :  { %1675 = vperm.xlu0 %2052, %v1672_v61  }
 0x916   :  { %2055 = vset.pattern.permute.xlu0 %v2262_v46 }
 0x962   :  { %v1666_v55 = vpop.xlane.xlu1 %1665 }
 0x963   :  { %v1667_v49 = vadd.f32 1e-06, %v1666_v55 }
 0x965   :  { %2165 = vrcp.f32 %v1667_v49 }
 0x972   :  { %v2166_v44 = vpop.eup %2165 }
 0x973   :  { %v1669_v1 = vmul.f32 %v2166_v44, %v1951_v0 }
 0x975   :  { %1671 = vst.msk [vmem:[#allocation7 + $0x10] sm:$0xff] %vm3131_vm7, %v1669_v1 }
 0x981   :  { %v312_v47 = vpop.xlane.xlu0 %311 }
 0x982   :  { %2167 = vrcp.f32 %v312_v47 }
 0x985   :  { %v1481_v30 = vpop.xlane.xlu0 %1480 }
 0x986   :  { %2169 = vrcp.f32 %v1481_v30 }
 0x98d   :  { %v1676_v17 = vpop.permute.xlu0 %1675 }
 0x98e   :  { %v1678_v18 = vmul.f32 %v1676_v17, %v1669_v1 }
 0x98f   :  { %v2168_v11 = vpop.eup %2167 }
 0x990   :  { %v320_v52 = vmul.f32 %v2168_v11, %v3039_v57 }
 0x992   :  { %1700 = vperm.xlu1 %2053, %v320_v52  }
 0x993   :  { %v2170_v25 = vpop.eup %2169 }
 0x994   :  { %v1483_v56 = vmul.f32 %v2170_v25, %v2160_v6 }
 0x996   :  { %v1679_v46 = vadd.f32 %v1678_v18, %v1483_v56  ;;  %2054 = vset.pattern.permute.xlu1 %v2260_v35 }
 0x997   :  { %1710 = vperm.xlu1 %2054, %v320_v52  }
 0x998   :  { %1684 = vrot.lane.b32.xlu0 %v1679_v46, %s2265_s27 }
 0x99b   :  { %1681 = vrot.lane.b32.xlu1 %v1679_v46, %s2264_s0 }
 0x99c   :  { %1694 = vperm.xlu0 %2055, %v320_v52  }
 0x99f   :  { %1687 = vrot.lane.b32.xlu1 %v1679_v46, %s2266_s28 }
 0x9a0   :  { %2056 = vset.pattern.permute.xlu0 %v2263_v48 }
 0x9a1   :  { %1722 = vperm.xlu0 %2056, %v258_v36  }
 0xa0a   :  { %v1685_v31 = vpop.permute.xlu0 %1684 }
 0xa0d   :  { %v1701_v57 = vpop.permute.xlu1 %1700 }
 0xa12   :  { %v1711_v38 = vpop.permute.xlu1 %1710 }
 0xa16   :  { %v1682_v19 = vpop.permute.xlu1 %1681 }
 0xa17   :  { %v1690_v50 = vsel %vm3132_vm15, %v1682_v19, %v1685_v31  ;;  %v1695_v51 = vpop.permute.xlu0 %1694 }
 0xa1a   :  { %v1688_v35 = vpop.permute.xlu1 %1687 }
 0xa1b   :  { %v1691_v28 = vsel %vm3133_vm11, %v1690_v50, %v1688_v35 }
 0xa1c   :  { %v1703_v14 = vmul.f32 %v1701_v57, %v1691_v28  ;;  %v1713_v40 = vmul.f32 %v1711_v38, %v1691_v28  ;;  %v1697_v58 = vmul.f32 %v1695_v51, %v1691_v28  ;;  %v1723_v54 = vpop.permute.xlu0 %1722 }
 0xa1d   :  { %v1956_v53 = vand.u32 2147483647, %v1723_v54  ;;  %v1961_v23 = vtrunc.f32 %v1723_v54  ;;  %vm1960_vm5 = vcmp.lt.f32.partialorder %v1723_v54, 0 }
 0xa1e   :  { %1705 = vrot.lane.b32.xlu1 %v1703_v14, %s2267_s29  ;;  %v1992_v10 = vsel %vm1960_vm5, 0, %v2269_v39  ;;  %v1980_v5 = vsel %vm1960_vm5, 2139095040, %v2256_v21 }
 0xa1f   :  { %v1965_v24 = vtrunc.f32 %v1956_v53  ;;  %vm1957_vm2 = vcmp.eq.f32.partialorder %v1956_v53, 2139095040  ;;  %vm1962_vm9 = vcmp.ne.f32.partialorder %v1723_v54, %v1961_v23  ;;  %vm1964_vm15 = vcmp.lt.f32.partialorder %v1956_v53, 1266679808 }
 0xa20   :  { %vm1963_vm3 = vmor %vm1962_vm9, %vm1957_vm2  ;;  %v1993_v41 = vxor.u32 2147483648, %v1992_v10 }
 0xa21   :  { %v1966_v27 = vcvt.f32.s32 %v1965_v24  ;;  %vm1969_vm10 = vmneg %vm1963_vm3 }
 0xa22   :  { %1715 = vrot.lane.b32.xlu1 %v1713_v40, %s2268_s30 }
 0xa23   :  { %v1967_v4 = vand.u32 1, %v1966_v27 }
 0xa25   :  { %vm1968_vm14 = vcmp.eq.s32.totalorder %v1967_v4, 1 }
 0xa26   :  { %vm1970_vm0 = vmand %vm1968_vm14, %vm1969_vm10 }
 0xa27   :  { %vm1971_vm9 = vmand %vm1964_vm15, %vm1970_vm0 }
 0xa28   :  { %v1994_v22 = vsel %vm1971_vm9, %v1993_v41, %v1992_v10 }
 0xa90   :  { %v1706_v34 = vpop.permute.xlu1 %1705 }
 0xa91   :  { %v1708_v48 = vadd.f32 %v1706_v34, %v1697_v58 }
 0xa94   :  { %v1716_v9 = vpop.permute.xlu1 %1715 }
 0xa95   :  { %v1718_v42 = vadd.f32 %v1716_v9, %v1708_v48 }
 0xa97   :  { %v1719_v29 = vmax.f32 %v1718_v42, 1e-06 }
 0xa99   :  { %v1952_v45 = vand.u32 2147483647, %v1719_v29  ;;  %vm1973_vm12 = vcmp.eq.f32.partialorder %v1719_v29, 0  ;;  %vm1972_vm13 = vcmp.lt.f32.partialorder %v1719_v29, 0  ;;  %vm1975_vm11 = vcmp.lt.s32.totalorder %v1719_v29, 0 }
 0xa9a   :  { %vm1985_vm1 = vmand %vm1960_vm5, %vm1973_vm12  ;;  %vm1989_vm14 = vcmp.eq.f32.partialorder %v1719_v29, 3212836864  ;;  %vm1997_vm10 = vcmp.ne.f32.partialorder %v1719_v29, %v1719_v29  ;;  %v1995_v12 = vsel %vm1972_vm13, %v1994_v22, %v1992_v10 }
 0xa9b   :  { %2171 = vlog2.f32 %v1952_v45  ;;  %vm1976_vm4 = vcmp.gt.f32.partialorder %v1952_v45, 1065353216  ;;  %vm1978_vm7 = vmand %vm1972_vm13, %vm1963_vm3  ;;  %vm1977_vm3 = vcmp.eq.f32.partialorder %v1952_v45, 2139095040 }
 0xa9c   :  { %vm1986_vm8 = vmxor %vm1960_vm5, %vm1976_vm4  ;;  %vm1958_vm5 = vcmp.eq.f32.partialorder %v1723_v54, 0 }
 0xa9d   :  { %vm1987_vm6 = vmor %vm1985_vm1, %vm1986_vm8  ;;  %vm1974_vm8 = vcmp.eq.f32.partialorder %v1719_v29, 1065353216  ;;  %vm1998_vm1 = vcmp.ne.f32.partialorder %v1723_v54, %v1723_v54 }
 0xa9e   :  { %v1988_v33 = vsel %vm1987_vm6, 2139095040, %v2256_v21  ;;  %vm1982_vm4 = vmand %vm1975_vm11, %vm1971_vm9  ;;  %vm1959_vm6 = vcmp.eq.f32.partialorder %v1723_v54, 1065353216 }
 0xa9f   :  { %v1990_v0 = vsel %vm1989_vm14, 1065353216, %v1988_v33  ;;  %vm2001_vm0 = vmor %vm1974_vm8, %vm1958_vm5 }
 0xaa8   :  { %v2172_v59 = vpop.eup %2171 }
 0xaa9   :  { %v1954_v62 = vmul.f32 %v2172_v59, %v1723_v54 }
 0xaab   :  { %2173 = vpow2.f32 %v1954_v62 }
 0xab8   :  { %v2174_v32 = vpop.eup %2173 }
 0xab9   :  { %v1979_v13 = vsel %vm1978_vm7, 2143289344, %v2174_v32  ;;  %vm3134_vm7 = vcmask 64512  }
 0xaba   :  { %v1981_v3 = vsel %vm1973_vm12, %v1980_v5, %v1979_v13  ;;  %vm1999_vm12 = vmor %vm1997_vm10, %vm1998_vm1 }
 0xabb   :  { %v1983_v2 = vxor.u32 2147483648, %v1981_v3 }
 0xabd   :  { %v1984_v15 = vsel %vm1982_vm4, %v1983_v2, %v1981_v3 }
 0xabe   :  { %v1991_v39 = vsel %vm1957_vm2, %v1990_v0, %v1984_v15  ;;  %vm3135_vm2 = vmmov %vm3134_vm7 }
 0xabf   :  { %v1996_v37 = vsel %vm1977_vm3, %v1995_v12, %v1991_v39 }
 0xac0   :  { %v2000_v8 = vsel %vm1999_vm12, 2143289344, %v1996_v37 }
 0xac1   :  { %v2002_v21 = vsel %vm2001_vm0, 1065353216, %v2000_v8 }
 0xac2   :  { %v2003_v26 = vsel %vm1959_vm6, %v1719_v29, %v2002_v21 }
 0xac3   :  { %v1726_v16 = vsel %vm3134_vm7, %v2003_v26, 0.0 }
 0xac4   :  { %1727 = vadd.xlane.f32.xlu1 %v1726_v16 }
 0xb4d   :  { %v1728_v60 = vpop.xlane.xlu1 %1727 }
 0xb4e   :  { %v1729_v6 = vadd.f32 1e-06, %v1728_v60 }
 0xb50   :  { %2175 = vrcp.f32 %v1729_v6 }
 0xb5d   :  { %v2176_v7 = vpop.eup %2175 }
 0xb5e   :  { %v1731_v20 = vmul.f32 %v2176_v7, %v2003_v26 }
 0xb60   :  { %1733 = vst.msk [vmem:[#allocation7 + $0x18] sm:$0xff] %vm3135_vm2, %v1731_v20 }
 0xb61   :  { %2236 = shalt.err (!%p2233_p0)
}
 0xb62   :  { %1745 = dma.vmem_to_hbm [thread:$0]  %s1740_s21, 512, %s3087_s4, [#allocation4], %s2252_s18, %s2252_s18, %s2253_s19  }
 0xb63   :  { %2249 = dma.done.wait [#allocation4], 512  }
 0xb64   :  { %2250 = vsyncadd [#allocation4], 4294966784 }
 0xb65   :  { %1749 = vsyncpa [#allocation3], 1 }
 0xb66   :  { %1750 = vsyncpa [#allocation6], 1 }
 0xb67   :  { %1751 = vsyncpa [#allocation4], 1 }

</bundles_post_ra>
